<compile_context>
chip_gen: v5e
topology: v5e:2x2
jax: 0.10.0
libtpu: 0.0.40
codegen_flags: <defaults>
</compile_context>

<pallas_src>
import functools

import numpy as np

import jax
import jax.numpy as jnp
from jax.experimental import pallas as pl
from jax.experimental.pallas import tpu as pltpu


_K = 5  # conv kernel size
_LAYERS = (
    dict(cin=3,  hin=32, win=32, cout=12, stride=2, pad=2, lanes_in=96,  lanes_out=256),
    dict(cin=12, hin=16, win=16, cout=12, stride=2, pad=2, lanes_in=256, lanes_out=128),
    dict(cin=12, hin=8,  win=8,  cout=12, stride=1, pad=2, lanes_in=128, lanes_out=128),
)
_FC_LANES_IN = 128
_FC_LANES_OUT = 128


# ----------------------------------------------------------------------------
# The fused Pallas kernel: 3 convs + FC, activations resident in VMEM.
# ----------------------------------------------------------------------------
def _lenet_fused_kernel(act1_ref,
                        s1_ref, w1_ref, b1_ref,
                        s2_ref, w2_ref, b2_ref,
                        s3_ref, w3_ref, b3_ref,
                        sfc_ref, wfc_ref, bfc_ref,
                        out_ref):
    def taps(act_bf16, s_ref, w_ref, b_ref):
        # sum_dy (S_dy @ ACT) @ W_dy + bias, accumulated in f32 on the MXU.
        n_taps = s_ref.shape[0]
        acc = None
        for dy in range(n_taps):                       # static unroll (5 or 8)
            rows = jnp.dot(s_ref[dy], act_bf16,
                           preferred_element_type=jnp.float32)
            rows = rows.astype(jnp.bfloat16)           # exact: S is 0/1 selection
            part = jnp.dot(rows, w_ref[dy],
                           preferred_element_type=jnp.float32)
            acc = part if acc is None else acc + part
        return acc + b_ref[...]

    a1 = act1_ref[...]                                                        # (B*32,  96) bf16
    a2 = jax.nn.sigmoid(taps(a1, s1_ref, w1_ref, b1_ref)).astype(jnp.bfloat16)  # (B*16, 256)
    a3 = jax.nn.sigmoid(taps(a2, s2_ref, w2_ref, b2_ref)).astype(jnp.bfloat16)  # (B*8,  128)
    a4 = jax.nn.sigmoid(taps(a3, s3_ref, w3_ref, b3_ref)).astype(jnp.bfloat16)  # (B*8,  128)
    out_ref[...] = taps(a4, sfc_ref, wfc_ref, bfc_ref)                          # (B,    128) f32


# ----------------------------------------------------------------------------
# One-time parameter preparation (numpy; off the per-call hot path).
# ----------------------------------------------------------------------------
def init_lenet_params(key, output_dim):
    keys = jax.random.split(key, 8)
    scale = 0.1
    return {
        "w1": scale * jax.random.normal(keys[0], (12, 3, 5, 5), jnp.float32),
        "b1": scale * jax.random.normal(keys[1], (12,), jnp.float32),
        "w2": scale * jax.random.normal(keys[2], (12, 12, 5, 5), jnp.float32),
        "b2": scale * jax.random.normal(keys[3], (12,), jnp.float32),
        "w3": scale * jax.random.normal(keys[4], (12, 12, 5, 5), jnp.float32),
        "b3": scale * jax.random.normal(keys[5], (12,), jnp.float32),
        "wfc": scale * jax.random.normal(keys[6], (output_dim, 768), jnp.float32),
        "bfc": scale * jax.random.normal(keys[7], (output_dim,), jnp.float32),
    }


def _conv_row_mats(w, b, cfg):
    """Fold kw taps, W-stride, W zero-pad and channel mixing of one conv into
    per-dy banded matrices W_dy: (K, lanes_in, lanes_out) + a tiled bias row."""
    cin, win, cout = cfg["cin"], cfg["win"], cfg["cout"]
    s, p = cfg["stride"], cfg["pad"]
    wout = (win + 2 * p - _K) // s + 1
    Wd = np.zeros((_K, cfg["lanes_in"], cfg["lanes_out"]), np.float32)
    for dy in range(_K):
        for wo in range(wout):
            for dx in range(_K):
                w_in = s * wo + dx - p
                if 0 <= w_in < win:
                    Wd[dy, w_in * cin:(w_in + 1) * cin,
                       wo * cout:(wo + 1) * cout] = w[:, :, dy, dx].T
    brow = np.zeros((1, cfg["lanes_out"]), np.float32)
    for wo in range(wout):
        brow[0, wo * cout:(wo + 1) * cout] = b
    return Wd, brow


def _conv_row_select(batch, cfg):
    """Per-dy 0/1 row-selection matrices S_dy: (K, B*H_out, B*H_in); folds the
    H-stride and H zero-padding (out-of-range taps -> all-zero rows)."""
    hin, s, p = cfg["hin"], cfg["stride"], cfg["pad"]
    hout = (hin + 2 * p - _K) // s + 1
    S = np.zeros((_K, batch * hout, batch * hin), np.float32)
    for dy in range(_K):
        for b in range(batch):
            for ho in range(hout):
                h_in = s * ho + dy - p
                if 0 <= h_in < hin:
                    S[dy, b * hout + ho, b * hin + h_in] = 1.0
    return S


def _fc_row_mats(wfc, bfc, batch):
    """FC as 8 row taps over the (B*8, 128) layer-3 rows; weight rows permuted
    so the contraction reproduces torch's NCHW .view(B,-1) flatten exactly."""
    out_dim = wfc.shape[0]
    H = W = 8
    C = 12
    assert out_dim <= _FC_LANES_OUT
    Wd = np.zeros((H, _FC_LANES_IN, _FC_LANES_OUT), np.float32)
    for ho in range(H):
        for wo in range(W):
            for co in range(C):
                Wd[ho, wo * C + co, :out_dim] = wfc[:, co * H * W + ho * W + wo]
    S = np.zeros((H, batch, batch * H), np.float32)
    for ho in range(H):
        for b in range(batch):
            S[ho, b, b * H + ho] = 1.0
    brow = np.zeros((1, _FC_LANES_OUT), np.float32)
    brow[0, :out_dim] = bfc
    return S, Wd, brow


def prepare_lenet_params(params, batch):
    """Convert torch-shaped params into the fused-kernel constants (once)."""
    p = {k: np.asarray(v) for k, v in params.items()}
    prep = {}
    for i, cfg in enumerate(_LAYERS, start=1):
        Wd, brow = _conv_row_mats(p[f"w{i}"], p[f"b{i}"], cfg)
        S = _conv_row_select(batch, cfg)
        prep[f"s{i}"] = jnp.asarray(S, jnp.bfloat16)
        prep[f"w{i}"] = jnp.asarray(Wd, jnp.bfloat16)
        prep[f"b{i}"] = jnp.asarray(brow, jnp.float32)
    Sfc, Wfc, bfc_row = _fc_row_mats(p["wfc"], p["bfc"], batch)
    prep["sfc"] = jnp.asarray(Sfc, jnp.bfloat16)
    prep["wfc"] = jnp.asarray(Wfc, jnp.bfloat16)
    prep["bfc"] = jnp.asarray(bfc_row, jnp.float32)
    return prep


# ----------------------------------------------------------------------------
# Jitted forward wrapper.
# ----------------------------------------------------------------------------
@functools.partial(jax.jit, static_argnames=("output_dim",))
def lenet_forward(prep, x_nchw, *, output_dim):
    B, C, H, W = x_nchw.shape
    # Tiny input-side glue: NCHW -> row matrix (B*H, W*C) in bf16.
    act1 = jnp.transpose(x_nchw, (0, 2, 3, 1)).reshape(B * H, W * C)
    act1 = act1.astype(jnp.bfloat16)

    vmem = pl.BlockSpec(memory_space=pltpu.MemorySpace.VMEM)
    out_padded = pl.pallas_call(
        _lenet_fused_kernel,
        out_shape=jax.ShapeDtypeStruct((B, _FC_LANES_OUT), jnp.float32),
        in_specs=[vmem] * 13,
        out_specs=vmem,
    )(act1,
      prep["s1"], prep["w1"], prep["b1"],
      prep["s2"], prep["w2"], prep["b2"],
      prep["s3"], prep["w3"], prep["b3"],
      prep["sfc"], prep["wfc"], prep["bfc"])
    return out_padded[:, :output_dim]


# ----------------------------------------------------------------------------
# Plain-JAX f32 reference (validation only).
# ----------------------------------------------------------------------------
def _im2col(x_nhwc, kh, kw, stride, pad):
    B, H, W, C = x_nhwc.shape
    xp = jnp.pad(x_nhwc, ((0, 0), (pad, pad), (pad, pad), (0, 0)))
    Ho = (H + 2 * pad - kh) // stride + 1
    Wo = (W + 2 * pad - kw) // stride + 1
    cols = []
    for dy in range(kh):
        for dx in range(kw):
            cols.append(xp[:, dy:dy + stride * Ho:stride,
                           dx:dx + stride * Wo:stride, :])
    patches = jnp.stack(cols, axis=3)
    return patches.reshape(B * Ho * Wo, kh * kw * C), Ho, Wo


def lenet_forward_reference(params, x_nchw):
    def conv_sig(x, w, b, stride, pad):
        Cout, Cin, kh, kw = w.shape
        Bsz = x.shape[0]
        patches, Ho, Wo = _im2col(x, kh, kw, stride, pad)
        wf = jnp.transpose(w, (2, 3, 1, 0)).reshape(kh * kw * Cin, Cout)
        y = jax.nn.sigmoid(patches @ wf + b)
        return y.reshape(Bsz, Ho, Wo, Cout)

    x = jnp.transpose(x_nchw, (0, 2, 3, 1))
    x = conv_sig(x, params["w1"], params["b1"], 2, 2)
    x = conv_sig(x, params["w2"], params["b2"], 2, 2)
    x = conv_sig(x, params["w3"], params["b3"], 1, 2)
    B = x.shape[0]
    flat = jnp.transpose(x, (0, 3, 1, 2)).reshape(B, -1)
    return flat @ params["wfc"].T + params["bfc"]


if __name__ == "__main__":
    output_dim = 10
    batch = 2
    key = jax.random.PRNGKey(0)
    k_params, k_x = jax.random.split(key)

    params = init_lenet_params(k_params, output_dim)
    prep = prepare_lenet_params(params, batch)
    # Linear(768) => 3x32x32 input (32 -> 16 -> 8 -> 8, 12*8*8 = 768).
    x = jax.random.normal(k_x, (batch, 3, 32, 32), jnp.float32)

    out = lenet_forward(prep, x, output_dim=output_dim)
    out = jax.block_until_ready(out)
    assert out.shape == (batch, output_dim), out.shape
    assert bool(jnp.all(jnp.isfinite(out)))

    # Sanity check vs plain-JAX f32 reference (bf16 matmul operands => loose tol).
    ref = jax.block_until_ready(jax.jit(lenet_forward_reference)(params, x))
    max_err = float(jnp.max(jnp.abs(out - ref)))
    assert max_err < 0.3, f"mismatch vs reference: {max_err}"

    print("KERNEL_OK")
</pallas_src>

<mosaic_0001>
module attributes {stable_mosaic.version = 11 : i64} {
  func.func @_lenet_fused_kernel(%arg0: memref<64x96xbf16, #tpu.memory_space<vmem>>, %arg1: memref<5x32x64xbf16, #tpu.memory_space<vmem>>, %arg2: memref<5x96x256xbf16, #tpu.memory_space<vmem>>, %arg3: memref<1x256xf32, #tpu.memory_space<vmem>>, %arg4: memref<5x16x32xbf16, #tpu.memory_space<vmem>>, %arg5: memref<5x256x128xbf16, #tpu.memory_space<vmem>>, %arg6: memref<1x128xf32, #tpu.memory_space<vmem>>, %arg7: memref<5x16x16xbf16, #tpu.memory_space<vmem>>, %arg8: memref<5x128x128xbf16, #tpu.memory_space<vmem>>, %arg9: memref<1x128xf32, #tpu.memory_space<vmem>>, %arg10: memref<8x2x16xbf16, #tpu.memory_space<vmem>>, %arg11: memref<8x128x128xbf16, #tpu.memory_space<vmem>>, %arg12: memref<1x128xf32, #tpu.memory_space<vmem>>, %arg13: memref<2x128xf32, #tpu.memory_space<vmem>>) attributes {dimension_semantics = [], scalar_prefetch = 0 : i64, scratch_operands = 0 : i64, tpu.core_type = #tpu.core_type<tc>} {
    %c0 = arith.constant 0 : index
    %c0_0 = arith.constant 0 : index
    %0 = vector.load %arg0[%c0, %c0_0] : memref<64x96xbf16, #tpu.memory_space<vmem>>, vector<64x96xbf16>
    %c0_1 = arith.constant 0 : index
    %c0_2 = arith.constant 0 : index
    %c0_3 = arith.constant 0 : index
    %1 = vector.load %arg1[%c0_1, %c0_2, %c0_3] : memref<5x32x64xbf16, #tpu.memory_space<vmem>>, vector<1x32x64xbf16>
    %2 = vector.shape_cast %1 : vector<1x32x64xbf16> to vector<32x64xbf16>
    %cst = arith.constant dense<0.000000e+00> : vector<32x96xf32>
    %3 = tpu.matmul %2, %0, %cst {dimension_numbers = #tpu.dot_dimension_numbers<[1], [0], [0], [1], [0, 0, 1, 1], [], []>} : vector<32x64xbf16>, vector<64x96xbf16>, vector<32x96xf32> -> vector<32x96xf32>
    %4 = arith.truncf %3 : vector<32x96xf32> to vector<32x96xbf16>
    %c0_4 = arith.constant 0 : index
    %c0_5 = arith.constant 0 : index
    %c0_6 = arith.constant 0 : index
    %5 = vector.load %arg2[%c0_4, %c0_5, %c0_6] : memref<5x96x256xbf16, #tpu.memory_space<vmem>>, vector<1x96x256xbf16>
    %6 = vector.shape_cast %5 : vector<1x96x256xbf16> to vector<96x256xbf16>
    %cst_7 = arith.constant dense<0.000000e+00> : vector<32x256xf32>
    %7 = tpu.matmul %4, %6, %cst_7 {dimension_numbers = #tpu.dot_dimension_numbers<[1], [0], [0], [1], [0, 0, 1, 1], [], []>} : vector<32x96xbf16>, vector<96x256xbf16>, vector<32x256xf32> -> vector<32x256xf32>
    %c1 = arith.constant 1 : index
    %c0_8 = arith.constant 0 : index
    %c0_9 = arith.constant 0 : index
    %8 = vector.load %arg1[%c1, %c0_8, %c0_9] : memref<5x32x64xbf16, #tpu.memory_space<vmem>>, vector<1x32x64xbf16>
    %9 = vector.shape_cast %8 : vector<1x32x64xbf16> to vector<32x64xbf16>
    %cst_10 = arith.constant dense<0.000000e+00> : vector<32x96xf32>
    %10 = tpu.matmul %9, %0, %cst_10 {dimension_numbers = #tpu.dot_dimension_numbers<[1], [0], [0], [1], [0, 0, 1, 1], [], []>} : vector<32x64xbf16>, vector<64x96xbf16>, vector<32x96xf32> -> vector<32x96xf32>
    %11 = arith.truncf %10 : vector<32x96xf32> to vector<32x96xbf16>
    %c1_11 = arith.constant 1 : index
    %c0_12 = arith.constant 0 : index
    %c0_13 = arith.constant 0 : index
    %12 = vector.load %arg2[%c1_11, %c0_12, %c0_13] : memref<5x96x256xbf16, #tpu.memory_space<vmem>>, vector<1x96x256xbf16>
    %13 = vector.shape_cast %12 : vector<1x96x256xbf16> to vector<96x256xbf16>
    %cst_14 = arith.constant dense<0.000000e+00> : vector<32x256xf32>
    %14 = tpu.matmul %11, %13, %cst_14 {dimension_numbers = #tpu.dot_dimension_numbers<[1], [0], [0], [1], [0, 0, 1, 1], [], []>} : vector<32x96xbf16>, vector<96x256xbf16>, vector<32x256xf32> -> vector<32x256xf32>
    %15 = arith.addf %7, %14 : vector<32x256xf32>
    %c2 = arith.constant 2 : index
    %c0_15 = arith.constant 0 : index
    %c0_16 = arith.constant 0 : index
    %16 = vector.load %arg1[%c2, %c0_15, %c0_16] : memref<5x32x64xbf16, #tpu.memory_space<vmem>>, vector<1x32x64xbf16>
    %17 = vector.shape_cast %16 : vector<1x32x64xbf16> to vector<32x64xbf16>
    %cst_17 = arith.constant dense<0.000000e+00> : vector<32x96xf32>
    %18 = tpu.matmul %17, %0, %cst_17 {dimension_numbers = #tpu.dot_dimension_numbers<[1], [0], [0], [1], [0, 0, 1, 1], [], []>} : vector<32x64xbf16>, vector<64x96xbf16>, vector<32x96xf32> -> vector<32x96xf32>
    %19 = arith.truncf %18 : vector<32x96xf32> to vector<32x96xbf16>
    %c2_18 = arith.constant 2 : index
    %c0_19 = arith.constant 0 : index
    %c0_20 = arith.constant 0 : index
    %20 = vector.load %arg2[%c2_18, %c0_19, %c0_20] : memref<5x96x256xbf16, #tpu.memory_space<vmem>>, vector<1x96x256xbf16>
    %21 = vector.shape_cast %20 : vector<1x96x256xbf16> to vector<96x256xbf16>
    %cst_21 = arith.constant dense<0.000000e+00> : vector<32x256xf32>
    %22 = tpu.matmul %19, %21, %cst_21 {dimension_numbers = #tpu.dot_dimension_numbers<[1], [0], [0], [1], [0, 0, 1, 1], [], []>} : vector<32x96xbf16>, vector<96x256xbf16>, vector<32x256xf32> -> vector<32x256xf32>
    %23 = arith.addf %15, %22 : vector<32x256xf32>
    %c3 = arith.constant 3 : index
    %c0_22 = arith.constant 0 : index
    %c0_23 = arith.constant 0 : index
    %24 = vector.load %arg1[%c3, %c0_22, %c0_23] : memref<5x32x64xbf16, #tpu.memory_space<vmem>>, vector<1x32x64xbf16>
    %25 = vector.shape_cast %24 : vector<1x32x64xbf16> to vector<32x64xbf16>
    %cst_24 = arith.constant dense<0.000000e+00> : vector<32x96xf32>
    %26 = tpu.matmul %25, %0, %cst_24 {dimension_numbers = #tpu.dot_dimension_numbers<[1], [0], [0], [1], [0, 0, 1, 1], [], []>} : vector<32x64xbf16>, vector<64x96xbf16>, vector<32x96xf32> -> vector<32x96xf32>
    %27 = arith.truncf %26 : vector<32x96xf32> to vector<32x96xbf16>
    %c3_25 = arith.constant 3 : index
    %c0_26 = arith.constant 0 : index
    %c0_27 = arith.constant 0 : index
    %28 = vector.load %arg2[%c3_25, %c0_26, %c0_27] : memref<5x96x256xbf16, #tpu.memory_space<vmem>>, vector<1x96x256xbf16>
    %29 = vector.shape_cast %28 : vector<1x96x256xbf16> to vector<96x256xbf16>
    %cst_28 = arith.constant dense<0.000000e+00> : vector<32x256xf32>
    %30 = tpu.matmul %27, %29, %cst_28 {dimension_numbers = #tpu.dot_dimension_numbers<[1], [0], [0], [1], [0, 0, 1, 1], [], []>} : vector<32x96xbf16>, vector<96x256xbf16>, vector<32x256xf32> -> vector<32x256xf32>
    %31 = arith.addf %23, %30 : vector<32x256xf32>
    %c4 = arith.constant 4 : index
    %c0_29 = arith.constant 0 : index
    %c0_30 = arith.constant 0 : index
    %32 = vector.load %arg1[%c4, %c0_29, %c0_30] : memref<5x32x64xbf16, #tpu.memory_space<vmem>>, vector<1x32x64xbf16>
    %33 = vector.shape_cast %32 : vector<1x32x64xbf16> to vector<32x64xbf16>
    %cst_31 = arith.constant dense<0.000000e+00> : vector<32x96xf32>
    %34 = tpu.matmul %33, %0, %cst_31 {dimension_numbers = #tpu.dot_dimension_numbers<[1], [0], [0], [1], [0, 0, 1, 1], [], []>} : vector<32x64xbf16>, vector<64x96xbf16>, vector<32x96xf32> -> vector<32x96xf32>
    %35 = arith.truncf %34 : vector<32x96xf32> to vector<32x96xbf16>
    %c4_32 = arith.constant 4 : index
    %c0_33 = arith.constant 0 : index
    %c0_34 = arith.constant 0 : index
    %36 = vector.load %arg2[%c4_32, %c0_33, %c0_34] : memref<5x96x256xbf16, #tpu.memory_space<vmem>>, vector<1x96x256xbf16>
    %37 = vector.shape_cast %36 : vector<1x96x256xbf16> to vector<96x256xbf16>
    %cst_35 = arith.constant dense<0.000000e+00> : vector<32x256xf32>
    %38 = tpu.matmul %35, %37, %cst_35 {dimension_numbers = #tpu.dot_dimension_numbers<[1], [0], [0], [1], [0, 0, 1, 1], [], []>} : vector<32x96xbf16>, vector<96x256xbf16>, vector<32x256xf32> -> vector<32x256xf32>
    %39 = arith.addf %31, %38 : vector<32x256xf32>
    %c0_36 = arith.constant 0 : index
    %c0_37 = arith.constant 0 : index
    %40 = vector.load %arg3[%c0_36, %c0_37] : memref<1x256xf32, #tpu.memory_space<vmem>>, vector<1x256xf32>
    %41 = vector.broadcast %40 : vector<1x256xf32> to vector<32x256xf32>
    %42 = arith.addf %39, %41 : vector<32x256xf32>
    %43 = arith.negf %42 : vector<32x256xf32>
    %44 = math.exp %43 : vector<32x256xf32>
    %cst_38 = arith.constant 1.000000e+00 : f32
    %45 = vector.broadcast %cst_38 : f32 to vector<32x256xf32>
    %46 = arith.addf %45, %44 : vector<32x256xf32>
    %47 = arith.divf %45, %46 : vector<32x256xf32>
    %48 = arith.truncf %47 : vector<32x256xf32> to vector<32x256xbf16>
    %c0_39 = arith.constant 0 : index
    %c0_40 = arith.constant 0 : index
    %c0_41 = arith.constant 0 : index
    %49 = vector.load %arg4[%c0_39, %c0_40, %c0_41] : memref<5x16x32xbf16, #tpu.memory_space<vmem>>, vector<1x16x32xbf16>
    %50 = vector.shape_cast %49 : vector<1x16x32xbf16> to vector<16x32xbf16>
    %cst_42 = arith.constant dense<0.000000e+00> : vector<16x256xf32>
    %51 = tpu.matmul %50, %48, %cst_42 {dimension_numbers = #tpu.dot_dimension_numbers<[1], [0], [0], [1], [0, 0, 1, 1], [], []>} : vector<16x32xbf16>, vector<32x256xbf16>, vector<16x256xf32> -> vector<16x256xf32>
    %52 = arith.truncf %51 : vector<16x256xf32> to vector<16x256xbf16>
    %c0_43 = arith.constant 0 : index
    %c0_44 = arith.constant 0 : index
    %c0_45 = arith.constant 0 : index
    %53 = vector.load %arg5[%c0_43, %c0_44, %c0_45] : memref<5x256x128xbf16, #tpu.memory_space<vmem>>, vector<1x256x128xbf16>
    %54 = vector.shape_cast %53 : vector<1x256x128xbf16> to vector<256x128xbf16>
    %cst_46 = arith.constant dense<0.000000e+00> : vector<16x128xf32>
    %55 = tpu.matmul %52, %54, %cst_46 {dimension_numbers = #tpu.dot_dimension_numbers<[1], [0], [0], [1], [0, 0, 1, 1], [], []>} : vector<16x256xbf16>, vector<256x128xbf16>, vector<16x128xf32> -> vector<16x128xf32>
    %c1_47 = arith.constant 1 : index
    %c0_48 = arith.constant 0 : index
    %c0_49 = arith.constant 0 : index
    %56 = vector.load %arg4[%c1_47, %c0_48, %c0_49] : memref<5x16x32xbf16, #tpu.memory_space<vmem>>, vector<1x16x32xbf16>
    %57 = vector.shape_cast %56 : vector<1x16x32xbf16> to vector<16x32xbf16>
    %cst_50 = arith.constant dense<0.000000e+00> : vector<16x256xf32>
    %58 = tpu.matmul %57, %48, %cst_50 {dimension_numbers = #tpu.dot_dimension_numbers<[1], [0], [0], [1], [0, 0, 1, 1], [], []>} : vector<16x32xbf16>, vector<32x256xbf16>, vector<16x256xf32> -> vector<16x256xf32>
    %59 = arith.truncf %58 : vector<16x256xf32> to vector<16x256xbf16>
    %c1_51 = arith.constant 1 : index
    %c0_52 = arith.constant 0 : index
    %c0_53 = arith.constant 0 : index
    %60 = vector.load %arg5[%c1_51, %c0_52, %c0_53] : memref<5x256x128xbf16, #tpu.memory_space<vmem>>, vector<1x256x128xbf16>
    %61 = vector.shape_cast %60 : vector<1x256x128xbf16> to vector<256x128xbf16>
    %cst_54 = arith.constant dense<0.000000e+00> : vector<16x128xf32>
    %62 = tpu.matmul %59, %61, %cst_54 {dimension_numbers = #tpu.dot_dimension_numbers<[1], [0], [0], [1], [0, 0, 1, 1], [], []>} : vector<16x256xbf16>, vector<256x128xbf16>, vector<16x128xf32> -> vector<16x128xf32>
    %63 = arith.addf %55, %62 : vector<16x128xf32>
    %c2_55 = arith.constant 2 : index
    %c0_56 = arith.constant 0 : index
    %c0_57 = arith.constant 0 : index
    %64 = vector.load %arg4[%c2_55, %c0_56, %c0_57] : memref<5x16x32xbf16, #tpu.memory_space<vmem>>, vector<1x16x32xbf16>
    %65 = vector.shape_cast %64 : vector<1x16x32xbf16> to vector<16x32xbf16>
    %cst_58 = arith.constant dense<0.000000e+00> : vector<16x256xf32>
    %66 = tpu.matmul %65, %48, %cst_58 {dimension_numbers = #tpu.dot_dimension_numbers<[1], [0], [0], [1], [0, 0, 1, 1], [], []>} : vector<16x32xbf16>, vector<32x256xbf16>, vector<16x256xf32> -> vector<16x256xf32>
    %67 = arith.truncf %66 : vector<16x256xf32> to vector<16x256xbf16>
    %c2_59 = arith.constant 2 : index
    %c0_60 = arith.constant 0 : index
    %c0_61 = arith.constant 0 : index
    %68 = vector.load %arg5[%c2_59, %c0_60, %c0_61] : memref<5x256x128xbf16, #tpu.memory_space<vmem>>, vector<1x256x128xbf16>
    %69 = vector.shape_cast %68 : vector<1x256x128xbf16> to vector<256x128xbf16>
    %cst_62 = arith.constant dense<0.000000e+00> : vector<16x128xf32>
    %70 = tpu.matmul %67, %69, %cst_62 {dimension_numbers = #tpu.dot_dimension_numbers<[1], [0], [0], [1], [0, 0, 1, 1], [], []>} : vector<16x256xbf16>, vector<256x128xbf16>, vector<16x128xf32> -> vector<16x128xf32>
    %71 = arith.addf %63, %70 : vector<16x128xf32>
    %c3_63 = arith.constant 3 : index
    %c0_64 = arith.constant 0 : index
    %c0_65 = arith.constant 0 : index
    %72 = vector.load %arg4[%c3_63, %c0_64, %c0_65] : memref<5x16x32xbf16, #tpu.memory_space<vmem>>, vector<1x16x32xbf16>
    %73 = vector.shape_cast %72 : vector<1x16x32xbf16> to vector<16x32xbf16>
    %cst_66 = arith.constant dense<0.000000e+00> : vector<16x256xf32>
    %74 = tpu.matmul %73, %48, %cst_66 {dimension_numbers = #tpu.dot_dimension_numbers<[1], [0], [0], [1], [0, 0, 1, 1], [], []>} : vector<16x32xbf16>, vector<32x256xbf16>, vector<16x256xf32> -> vector<16x256xf32>
    %75 = arith.truncf %74 : vector<16x256xf32> to vector<16x256xbf16>
    %c3_67 = arith.constant 3 : index
    %c0_68 = arith.constant 0 : index
    %c0_69 = arith.constant 0 : index
    %76 = vector.load %arg5[%c3_67, %c0_68, %c0_69] : memref<5x256x128xbf16, #tpu.memory_space<vmem>>, vector<1x256x128xbf16>
    %77 = vector.shape_cast %76 : vector<1x256x128xbf16> to vector<256x128xbf16>
    %cst_70 = arith.constant dense<0.000000e+00> : vector<16x128xf32>
    %78 = tpu.matmul %75, %77, %cst_70 {dimension_numbers = #tpu.dot_dimension_numbers<[1], [0], [0], [1], [0, 0, 1, 1], [], []>} : vector<16x256xbf16>, vector<256x128xbf16>, vector<16x128xf32> -> vector<16x128xf32>
    %79 = arith.addf %71, %78 : vector<16x128xf32>
    %c4_71 = arith.constant 4 : index
    %c0_72 = arith.constant 0 : index
    %c0_73 = arith.constant 0 : index
    %80 = vector.load %arg4[%c4_71, %c0_72, %c0_73] : memref<5x16x32xbf16, #tpu.memory_space<vmem>>, vector<1x16x32xbf16>
    %81 = vector.shape_cast %80 : vector<1x16x32xbf16> to vector<16x32xbf16>
    %cst_74 = arith.constant dense<0.000000e+00> : vector<16x256xf32>
    %82 = tpu.matmul %81, %48, %cst_74 {dimension_numbers = #tpu.dot_dimension_numbers<[1], [0], [0], [1], [0, 0, 1, 1], [], []>} : vector<16x32xbf16>, vector<32x256xbf16>, vector<16x256xf32> -> vector<16x256xf32>
    %83 = arith.truncf %82 : vector<16x256xf32> to vector<16x256xbf16>
    %c4_75 = arith.constant 4 : index
    %c0_76 = arith.constant 0 : index
    %c0_77 = arith.constant 0 : index
    %84 = vector.load %arg5[%c4_75, %c0_76, %c0_77] : memref<5x256x128xbf16, #tpu.memory_space<vmem>>, vector<1x256x128xbf16>
    %85 = vector.shape_cast %84 : vector<1x256x128xbf16> to vector<256x128xbf16>
    %cst_78 = arith.constant dense<0.000000e+00> : vector<16x128xf32>
    %86 = tpu.matmul %83, %85, %cst_78 {dimension_numbers = #tpu.dot_dimension_numbers<[1], [0], [0], [1], [0, 0, 1, 1], [], []>} : vector<16x256xbf16>, vector<256x128xbf16>, vector<16x128xf32> -> vector<16x128xf32>
    %87 = arith.addf %79, %86 : vector<16x128xf32>
    %c0_79 = arith.constant 0 : index
    %c0_80 = arith.constant 0 : index
    %88 = vector.load %arg6[%c0_79, %c0_80] : memref<1x128xf32, #tpu.memory_space<vmem>>, vector<1x128xf32>
    %89 = vector.broadcast %88 : vector<1x128xf32> to vector<16x128xf32>
    %90 = arith.addf %87, %89 : vector<16x128xf32>
    %91 = arith.negf %90 : vector<16x128xf32>
    %92 = math.exp %91 : vector<16x128xf32>
    %cst_81 = arith.constant 1.000000e+00 : f32
    %93 = vector.broadcast %cst_81 : f32 to vector<16x128xf32>
    %94 = arith.addf %93, %92 : vector<16x128xf32>
    %95 = arith.divf %93, %94 : vector<16x128xf32>
    %96 = arith.truncf %95 : vector<16x128xf32> to vector<16x128xbf16>
    %c0_82 = arith.constant 0 : index
    %c0_83 = arith.constant 0 : index
    %c0_84 = arith.constant 0 : index
    %97 = vector.load %arg7[%c0_82, %c0_83, %c0_84] : memref<5x16x16xbf16, #tpu.memory_space<vmem>>, vector<1x16x16xbf16>
    %98 = vector.shape_cast %97 : vector<1x16x16xbf16> to vector<16x16xbf16>
    %cst_85 = arith.constant dense<0.000000e+00> : vector<16x128xf32>
    %99 = tpu.matmul %98, %96, %cst_85 {dimension_numbers = #tpu.dot_dimension_numbers<[1], [0], [0], [1], [0, 0, 1, 1], [], []>} : vector<16x16xbf16>, vector<16x128xbf16>, vector<16x128xf32> -> vector<16x128xf32>
    %100 = arith.truncf %99 : vector<16x128xf32> to vector<16x128xbf16>
    %c0_86 = arith.constant 0 : index
    %c0_87 = arith.constant 0 : index
    %c0_88 = arith.constant 0 : index
    %101 = vector.load %arg8[%c0_86, %c0_87, %c0_88] : memref<5x128x128xbf16, #tpu.memory_space<vmem>>, vector<1x128x128xbf16>
    %102 = vector.shape_cast %101 : vector<1x128x128xbf16> to vector<128x128xbf16>
    %cst_89 = arith.constant dense<0.000000e+00> : vector<16x128xf32>
    %103 = tpu.matmul %100, %102, %cst_89 {dimension_numbers = #tpu.dot_dimension_numbers<[1], [0], [0], [1], [0, 0, 1, 1], [], []>} : vector<16x128xbf16>, vector<128x128xbf16>, vector<16x128xf32> -> vector<16x128xf32>
    %c1_90 = arith.constant 1 : index
    %c0_91 = arith.constant 0 : index
    %c0_92 = arith.constant 0 : index
    %104 = vector.load %arg7[%c1_90, %c0_91, %c0_92] : memref<5x16x16xbf16, #tpu.memory_space<vmem>>, vector<1x16x16xbf16>
    %105 = vector.shape_cast %104 : vector<1x16x16xbf16> to vector<16x16xbf16>
    %cst_93 = arith.constant dense<0.000000e+00> : vector<16x128xf32>
    %106 = tpu.matmul %105, %96, %cst_93 {dimension_numbers = #tpu.dot_dimension_numbers<[1], [0], [0], [1], [0, 0, 1, 1], [], []>} : vector<16x16xbf16>, vector<16x128xbf16>, vector<16x128xf32> -> vector<16x128xf32>
    %107 = arith.truncf %106 : vector<16x128xf32> to vector<16x128xbf16>
    %c1_94 = arith.constant 1 : index
    %c0_95 = arith.constant 0 : index
    %c0_96 = arith.constant 0 : index
    %108 = vector.load %arg8[%c1_94, %c0_95, %c0_96] : memref<5x128x128xbf16, #tpu.memory_space<vmem>>, vector<1x128x128xbf16>
    %109 = vector.shape_cast %108 : vector<1x128x128xbf16> to vector<128x128xbf16>
    %cst_97 = arith.constant dense<0.000000e+00> : vector<16x128xf32>
    %110 = tpu.matmul %107, %109, %cst_97 {dimension_numbers = #tpu.dot_dimension_numbers<[1], [0], [0], [1], [0, 0, 1, 1], [], []>} : vector<16x128xbf16>, vector<128x128xbf16>, vector<16x128xf32> -> vector<16x128xf32>
    %111 = arith.addf %103, %110 : vector<16x128xf32>
    %c2_98 = arith.constant 2 : index
    %c0_99 = arith.constant 0 : index
    %c0_100 = arith.constant 0 : index
    %112 = vector.load %arg7[%c2_98, %c0_99, %c0_100] : memref<5x16x16xbf16, #tpu.memory_space<vmem>>, vector<1x16x16xbf16>
    %113 = vector.shape_cast %112 : vector<1x16x16xbf16> to vector<16x16xbf16>
    %cst_101 = arith.constant dense<0.000000e+00> : vector<16x128xf32>
    %114 = tpu.matmul %113, %96, %cst_101 {dimension_numbers = #tpu.dot_dimension_numbers<[1], [0], [0], [1], [0, 0, 1, 1], [], []>} : vector<16x16xbf16>, vector<16x128xbf16>, vector<16x128xf32> -> vector<16x128xf32>
    %115 = arith.truncf %114 : vector<16x128xf32> to vector<16x128xbf16>
    %c2_102 = arith.constant 2 : index
    %c0_103 = arith.constant 0 : index
    %c0_104 = arith.constant 0 : index
    %116 = vector.load %arg8[%c2_102, %c0_103, %c0_104] : memref<5x128x128xbf16, #tpu.memory_space<vmem>>, vector<1x128x128xbf16>
    %117 = vector.shape_cast %116 : vector<1x128x128xbf16> to vector<128x128xbf16>
    %cst_105 = arith.constant dense<0.000000e+00> : vector<16x128xf32>
    %118 = tpu.matmul %115, %117, %cst_105 {dimension_numbers = #tpu.dot_dimension_numbers<[1], [0], [0], [1], [0, 0, 1, 1], [], []>} : vector<16x128xbf16>, vector<128x128xbf16>, vector<16x128xf32> -> vector<16x128xf32>
    %119 = arith.addf %111, %118 : vector<16x128xf32>
    %c3_106 = arith.constant 3 : index
    %c0_107 = arith.constant 0 : index
    %c0_108 = arith.constant 0 : index
    %120 = vector.load %arg7[%c3_106, %c0_107, %c0_108] : memref<5x16x16xbf16, #tpu.memory_space<vmem>>, vector<1x16x16xbf16>
    %121 = vector.shape_cast %120 : vector<1x16x16xbf16> to vector<16x16xbf16>
    %cst_109 = arith.constant dense<0.000000e+00> : vector<16x128xf32>
    %122 = tpu.matmul %121, %96, %cst_109 {dimension_numbers = #tpu.dot_dimension_numbers<[1], [0], [0], [1], [0, 0, 1, 1], [], []>} : vector<16x16xbf16>, vector<16x128xbf16>, vector<16x128xf32> -> vector<16x128xf32>
    %123 = arith.truncf %122 : vector<16x128xf32> to vector<16x128xbf16>
    %c3_110 = arith.constant 3 : index
    %c0_111 = arith.constant 0 : index
    %c0_112 = arith.constant 0 : index
    %124 = vector.load %arg8[%c3_110, %c0_111, %c0_112] : memref<5x128x128xbf16, #tpu.memory_space<vmem>>, vector<1x128x128xbf16>
    %125 = vector.shape_cast %124 : vector<1x128x128xbf16> to vector<128x128xbf16>
    %cst_113 = arith.constant dense<0.000000e+00> : vector<16x128xf32>
    %126 = tpu.matmul %123, %125, %cst_113 {dimension_numbers = #tpu.dot_dimension_numbers<[1], [0], [0], [1], [0, 0, 1, 1], [], []>} : vector<16x128xbf16>, vector<128x128xbf16>, vector<16x128xf32> -> vector<16x128xf32>
    %127 = arith.addf %119, %126 : vector<16x128xf32>
    %c4_114 = arith.constant 4 : index
    %c0_115 = arith.constant 0 : index
    %c0_116 = arith.constant 0 : index
    %128 = vector.load %arg7[%c4_114, %c0_115, %c0_116] : memref<5x16x16xbf16, #tpu.memory_space<vmem>>, vector<1x16x16xbf16>
    %129 = vector.shape_cast %128 : vector<1x16x16xbf16> to vector<16x16xbf16>
    %cst_117 = arith.constant dense<0.000000e+00> : vector<16x128xf32>
    %130 = tpu.matmul %129, %96, %cst_117 {dimension_numbers = #tpu.dot_dimension_numbers<[1], [0], [0], [1], [0, 0, 1, 1], [], []>} : vector<16x16xbf16>, vector<16x128xbf16>, vector<16x128xf32> -> vector<16x128xf32>
    %131 = arith.truncf %130 : vector<16x128xf32> to vector<16x128xbf16>
    %c4_118 = arith.constant 4 : index
    %c0_119 = arith.constant 0 : index
    %c0_120 = arith.constant 0 : index
    %132 = vector.load %arg8[%c4_118, %c0_119, %c0_120] : memref<5x128x128xbf16, #tpu.memory_space<vmem>>, vector<1x128x128xbf16>
    %133 = vector.shape_cast %132 : vector<1x128x128xbf16> to vector<128x128xbf16>
    %cst_121 = arith.constant dense<0.000000e+00> : vector<16x128xf32>
    %134 = tpu.matmul %131, %133, %cst_121 {dimension_numbers = #tpu.dot_dimension_numbers<[1], [0], [0], [1], [0, 0, 1, 1], [], []>} : vector<16x128xbf16>, vector<128x128xbf16>, vector<16x128xf32> -> vector<16x128xf32>
    %135 = arith.addf %127, %134 : vector<16x128xf32>
    %c0_122 = arith.constant 0 : index
    %c0_123 = arith.constant 0 : index
    %136 = vector.load %arg9[%c0_122, %c0_123] : memref<1x128xf32, #tpu.memory_space<vmem>>, vector<1x128xf32>
    %137 = vector.broadcast %136 : vector<1x128xf32> to vector<16x128xf32>
    %138 = arith.addf %135, %137 : vector<16x128xf32>
    %139 = arith.negf %138 : vector<16x128xf32>
    %140 = math.exp %139 : vector<16x128xf32>
    %cst_124 = arith.constant 1.000000e+00 : f32
    %141 = vector.broadcast %cst_124 : f32 to vector<16x128xf32>
    %142 = arith.addf %141, %140 : vector<16x128xf32>
    %143 = arith.divf %141, %142 : vector<16x128xf32>
    %144 = arith.truncf %143 : vector<16x128xf32> to vector<16x128xbf16>
    %c0_125 = arith.constant 0 : index
    %c0_126 = arith.constant 0 : index
    %c0_127 = arith.constant 0 : index
    %145 = vector.load %arg10[%c0_125, %c0_126, %c0_127] : memref<8x2x16xbf16, #tpu.memory_space<vmem>>, vector<1x2x16xbf16>
    %146 = vector.shape_cast %145 : vector<1x2x16xbf16> to vector<2x16xbf16>
    %cst_128 = arith.constant dense<0.000000e+00> : vector<2x128xf32>
    %147 = tpu.matmul %146, %144, %cst_128 {dimension_numbers = #tpu.dot_dimension_numbers<[1], [0], [0], [1], [0, 0, 1, 1], [], []>} : vector<2x16xbf16>, vector<16x128xbf16>, vector<2x128xf32> -> vector<2x128xf32>
    %148 = arith.truncf %147 : vector<2x128xf32> to vector<2x128xbf16>
    %c0_129 = arith.constant 0 : index
    %c0_130 = arith.constant 0 : index
    %c0_131 = arith.constant 0 : index
    %149 = vector.load %arg11[%c0_129, %c0_130, %c0_131] : memref<8x128x128xbf16, #tpu.memory_space<vmem>>, vector<1x128x128xbf16>
    %150 = vector.shape_cast %149 : vector<1x128x128xbf16> to vector<128x128xbf16>
    %cst_132 = arith.constant dense<0.000000e+00> : vector<2x128xf32>
    %151 = tpu.matmul %148, %150, %cst_132 {dimension_numbers = #tpu.dot_dimension_numbers<[1], [0], [0], [1], [0, 0, 1, 1], [], []>} : vector<2x128xbf16>, vector<128x128xbf16>, vector<2x128xf32> -> vector<2x128xf32>
    %c1_133 = arith.constant 1 : index
    %c0_134 = arith.constant 0 : index
    %c0_135 = arith.constant 0 : index
    %152 = vector.load %arg10[%c1_133, %c0_134, %c0_135] : memref<8x2x16xbf16, #tpu.memory_space<vmem>>, vector<1x2x16xbf16>
    %153 = vector.shape_cast %152 : vector<1x2x16xbf16> to vector<2x16xbf16>
    %cst_136 = arith.constant dense<0.000000e+00> : vector<2x128xf32>
    %154 = tpu.matmul %153, %144, %cst_136 {dimension_numbers = #tpu.dot_dimension_numbers<[1], [0], [0], [1], [0, 0, 1, 1], [], []>} : vector<2x16xbf16>, vector<16x128xbf16>, vector<2x128xf32> -> vector<2x128xf32>
    %155 = arith.truncf %154 : vector<2x128xf32> to vector<2x128xbf16>
    %c1_137 = arith.constant 1 : index
    %c0_138 = arith.constant 0 : index
    %c0_139 = arith.constant 0 : index
    %156 = vector.load %arg11[%c1_137, %c0_138, %c0_139] : memref<8x128x128xbf16, #tpu.memory_space<vmem>>, vector<1x128x128xbf16>
    %157 = vector.shape_cast %156 : vector<1x128x128xbf16> to vector<128x128xbf16>
    %cst_140 = arith.constant dense<0.000000e+00> : vector<2x128xf32>
    %158 = tpu.matmul %155, %157, %cst_140 {dimension_numbers = #tpu.dot_dimension_numbers<[1], [0], [0], [1], [0, 0, 1, 1], [], []>} : vector<2x128xbf16>, vector<128x128xbf16>, vector<2x128xf32> -> vector<2x128xf32>
    %159 = arith.addf %151, %158 : vector<2x128xf32>
    %c2_141 = arith.constant 2 : index
    %c0_142 = arith.constant 0 : index
    %c0_143 = arith.constant 0 : index
    %160 = vector.load %arg10[%c2_141, %c0_142, %c0_143] : memref<8x2x16xbf16, #tpu.memory_space<vmem>>, vector<1x2x16xbf16>
    %161 = vector.shape_cast %160 : vector<1x2x16xbf16> to vector<2x16xbf16>
    %cst_144 = arith.constant dense<0.000000e+00> : vector<2x128xf32>
    %162 = tpu.matmul %161, %144, %cst_144 {dimension_numbers = #tpu.dot_dimension_numbers<[1], [0], [0], [1], [0, 0, 1, 1], [], []>} : vector<2x16xbf16>, vector<16x128xbf16>, vector<2x128xf32> -> vector<2x128xf32>
    %163 = arith.truncf %162 : vector<2x128xf32> to vector<2x128xbf16>
    %c2_145 = arith.constant 2 : index
    %c0_146 = arith.constant 0 : index
    %c0_147 = arith.constant 0 : index
    %164 = vector.load %arg11[%c2_145, %c0_146, %c0_147] : memref<8x128x128xbf16, #tpu.memory_space<vmem>>, vector<1x128x128xbf16>
    %165 = vector.shape_cast %164 : vector<1x128x128xbf16> to vector<128x128xbf16>
    %cst_148 = arith.constant dense<0.000000e+00> : vector<2x128xf32>
    %166 = tpu.matmul %163, %165, %cst_148 {dimension_numbers = #tpu.dot_dimension_numbers<[1], [0], [0], [1], [0, 0, 1, 1], [], []>} : vector<2x128xbf16>, vector<128x128xbf16>, vector<2x128xf32> -> vector<2x128xf32>
    %167 = arith.addf %159, %166 : vector<2x128xf32>
    %c3_149 = arith.constant 3 : index
    %c0_150 = arith.constant 0 : index
    %c0_151 = arith.constant 0 : index
    %168 = vector.load %arg10[%c3_149, %c0_150, %c0_151] : memref<8x2x16xbf16, #tpu.memory_space<vmem>>, vector<1x2x16xbf16>
    %169 = vector.shape_cast %168 : vector<1x2x16xbf16> to vector<2x16xbf16>
    %cst_152 = arith.constant dense<0.000000e+00> : vector<2x128xf32>
    %170 = tpu.matmul %169, %144, %cst_152 {dimension_numbers = #tpu.dot_dimension_numbers<[1], [0], [0], [1], [0, 0, 1, 1], [], []>} : vector<2x16xbf16>, vector<16x128xbf16>, vector<2x128xf32> -> vector<2x128xf32>
    %171 = arith.truncf %170 : vector<2x128xf32> to vector<2x128xbf16>
    %c3_153 = arith.constant 3 : index
    %c0_154 = arith.constant 0 : index
    %c0_155 = arith.constant 0 : index
    %172 = vector.load %arg11[%c3_153, %c0_154, %c0_155] : memref<8x128x128xbf16, #tpu.memory_space<vmem>>, vector<1x128x128xbf16>
    %173 = vector.shape_cast %172 : vector<1x128x128xbf16> to vector<128x128xbf16>
    %cst_156 = arith.constant dense<0.000000e+00> : vector<2x128xf32>
    %174 = tpu.matmul %171, %173, %cst_156 {dimension_numbers = #tpu.dot_dimension_numbers<[1], [0], [0], [1], [0, 0, 1, 1], [], []>} : vector<2x128xbf16>, vector<128x128xbf16>, vector<2x128xf32> -> vector<2x128xf32>
    %175 = arith.addf %167, %174 : vector<2x128xf32>
    %c4_157 = arith.constant 4 : index
    %c0_158 = arith.constant 0 : index
    %c0_159 = arith.constant 0 : index
    %176 = vector.load %arg10[%c4_157, %c0_158, %c0_159] : memref<8x2x16xbf16, #tpu.memory_space<vmem>>, vector<1x2x16xbf16>
    %177 = vector.shape_cast %176 : vector<1x2x16xbf16> to vector<2x16xbf16>
    %cst_160 = arith.constant dense<0.000000e+00> : vector<2x128xf32>
    %178 = tpu.matmul %177, %144, %cst_160 {dimension_numbers = #tpu.dot_dimension_numbers<[1], [0], [0], [1], [0, 0, 1, 1], [], []>} : vector<2x16xbf16>, vector<16x128xbf16>, vector<2x128xf32> -> vector<2x128xf32>
    %179 = arith.truncf %178 : vector<2x128xf32> to vector<2x128xbf16>
    %c4_161 = arith.constant 4 : index
    %c0_162 = arith.constant 0 : index
    %c0_163 = arith.constant 0 : index
    %180 = vector.load %arg11[%c4_161, %c0_162, %c0_163] : memref<8x128x128xbf16, #tpu.memory_space<vmem>>, vector<1x128x128xbf16>
    %181 = vector.shape_cast %180 : vector<1x128x128xbf16> to vector<128x128xbf16>
    %cst_164 = arith.constant dense<0.000000e+00> : vector<2x128xf32>
    %182 = tpu.matmul %179, %181, %cst_164 {dimension_numbers = #tpu.dot_dimension_numbers<[1], [0], [0], [1], [0, 0, 1, 1], [], []>} : vector<2x128xbf16>, vector<128x128xbf16>, vector<2x128xf32> -> vector<2x128xf32>
    %183 = arith.addf %175, %182 : vector<2x128xf32>
    %c5 = arith.constant 5 : index
    %c0_165 = arith.constant 0 : index
    %c0_166 = arith.constant 0 : index
    %184 = vector.load %arg10[%c5, %c0_165, %c0_166] : memref<8x2x16xbf16, #tpu.memory_space<vmem>>, vector<1x2x16xbf16>
    %185 = vector.shape_cast %184 : vector<1x2x16xbf16> to vector<2x16xbf16>
    %cst_167 = arith.constant dense<0.000000e+00> : vector<2x128xf32>
    %186 = tpu.matmul %185, %144, %cst_167 {dimension_numbers = #tpu.dot_dimension_numbers<[1], [0], [0], [1], [0, 0, 1, 1], [], []>} : vector<2x16xbf16>, vector<16x128xbf16>, vector<2x128xf32> -> vector<2x128xf32>
    %187 = arith.truncf %186 : vector<2x128xf32> to vector<2x128xbf16>
    %c5_168 = arith.constant 5 : index
    %c0_169 = arith.constant 0 : index
    %c0_170 = arith.constant 0 : index
    %188 = vector.load %arg11[%c5_168, %c0_169, %c0_170] : memref<8x128x128xbf16, #tpu.memory_space<vmem>>, vector<1x128x128xbf16>
    %189 = vector.shape_cast %188 : vector<1x128x128xbf16> to vector<128x128xbf16>
    %cst_171 = arith.constant dense<0.000000e+00> : vector<2x128xf32>
    %190 = tpu.matmul %187, %189, %cst_171 {dimension_numbers = #tpu.dot_dimension_numbers<[1], [0], [0], [1], [0, 0, 1, 1], [], []>} : vector<2x128xbf16>, vector<128x128xbf16>, vector<2x128xf32> -> vector<2x128xf32>
    %191 = arith.addf %183, %190 : vector<2x128xf32>
    %c6 = arith.constant 6 : index
    %c0_172 = arith.constant 0 : index
    %c0_173 = arith.constant 0 : index
    %192 = vector.load %arg10[%c6, %c0_172, %c0_173] : memref<8x2x16xbf16, #tpu.memory_space<vmem>>, vector<1x2x16xbf16>
    %193 = vector.shape_cast %192 : vector<1x2x16xbf16> to vector<2x16xbf16>
    %cst_174 = arith.constant dense<0.000000e+00> : vector<2x128xf32>
    %194 = tpu.matmul %193, %144, %cst_174 {dimension_numbers = #tpu.dot_dimension_numbers<[1], [0], [0], [1], [0, 0, 1, 1], [], []>} : vector<2x16xbf16>, vector<16x128xbf16>, vector<2x128xf32> -> vector<2x128xf32>
    %195 = arith.truncf %194 : vector<2x128xf32> to vector<2x128xbf16>
    %c6_175 = arith.constant 6 : index
    %c0_176 = arith.constant 0 : index
    %c0_177 = arith.constant 0 : index
    %196 = vector.load %arg11[%c6_175, %c0_176, %c0_177] : memref<8x128x128xbf16, #tpu.memory_space<vmem>>, vector<1x128x128xbf16>
    %197 = vector.shape_cast %196 : vector<1x128x128xbf16> to vector<128x128xbf16>
    %cst_178 = arith.constant dense<0.000000e+00> : vector<2x128xf32>
    %198 = tpu.matmul %195, %197, %cst_178 {dimension_numbers = #tpu.dot_dimension_numbers<[1], [0], [0], [1], [0, 0, 1, 1], [], []>} : vector<2x128xbf16>, vector<128x128xbf16>, vector<2x128xf32> -> vector<2x128xf32>
    %199 = arith.addf %191, %198 : vector<2x128xf32>
    %c7 = arith.constant 7 : index
    %c0_179 = arith.constant 0 : index
    %c0_180 = arith.constant 0 : index
    %200 = vector.load %arg10[%c7, %c0_179, %c0_180] : memref<8x2x16xbf16, #tpu.memory_space<vmem>>, vector<1x2x16xbf16>
    %201 = vector.shape_cast %200 : vector<1x2x16xbf16> to vector<2x16xbf16>
    %cst_181 = arith.constant dense<0.000000e+00> : vector<2x128xf32>
    %202 = tpu.matmul %201, %144, %cst_181 {dimension_numbers = #tpu.dot_dimension_numbers<[1], [0], [0], [1], [0, 0, 1, 1], [], []>} : vector<2x16xbf16>, vector<16x128xbf16>, vector<2x128xf32> -> vector<2x128xf32>
    %203 = arith.truncf %202 : vector<2x128xf32> to vector<2x128xbf16>
    %c7_182 = arith.constant 7 : index
    %c0_183 = arith.constant 0 : index
    %c0_184 = arith.constant 0 : index
    %204 = vector.load %arg11[%c7_182, %c0_183, %c0_184] : memref<8x128x128xbf16, #tpu.memory_space<vmem>>, vector<1x128x128xbf16>
    %205 = vector.shape_cast %204 : vector<1x128x128xbf16> to vector<128x128xbf16>
    %cst_185 = arith.constant dense<0.000000e+00> : vector<2x128xf32>
    %206 = tpu.matmul %203, %205, %cst_185 {dimension_numbers = #tpu.dot_dimension_numbers<[1], [0], [0], [1], [0, 0, 1, 1], [], []>} : vector<2x128xbf16>, vector<128x128xbf16>, vector<2x128xf32> -> vector<2x128xf32>
    %207 = arith.addf %199, %206 : vector<2x128xf32>
    %c0_186 = arith.constant 0 : index
    %c0_187 = arith.constant 0 : index
    %208 = vector.load %arg12[%c0_186, %c0_187] : memref<1x128xf32, #tpu.memory_space<vmem>>, vector<1x128xf32>
    %209 = vector.broadcast %208 : vector<1x128xf32> to vector<2x128xf32>
    %210 = arith.addf %207, %209 : vector<2x128xf32>
    %c0_188 = arith.constant 0 : index
    %c0_189 = arith.constant 0 : index
    %211 = vector.load %arg13[%c0_188, %c0_189] : memref<2x128xf32, #tpu.memory_space<vmem>>, vector<2x128xf32>
    tpu.vector_store %arg13[%c0_188, %c0_189], %210 {strides = array<i32>} : memref<2x128xf32, #tpu.memory_space<vmem>>, vector<2x128xf32>,
    return
  }
}

</mosaic_0001>

<bundles_post_ra>
// kernel: lenet_forward.1
= control target key start
LH: loop header
LB: loop body
LE: loop exit
PB: predicated region body
PF: predicated region fallthrough
CT: control target
= control target key end

     0   :  { %18 = vsyncpa [#allocation3], 0  ;;  %s6087_s0 = inlined_call_operand.vmem [shape: bf16[64,96], index: 0, kind: input, shape index: {}]   ;;  %s6088_s1 = inlined_call_operand.hbm [shape: bf16[5,32,64], index: 1, kind: input, shape index: {}]   ;;  %s6089_s2 = inlined_call_operand.hbm [shape: bf16[5,96,256], index: 2, kind: input, shape index: {}]   ;;  %s6090_s3 = inlined_call_operand.vmem [shape: f32[1,256], index: 3, kind: input, shape index: {}]   ;;  %s6091_s4 = inlined_call_operand.vmem [shape: bf16[5,16,32], index: 4, kind: input, shape index: {}]   ;;  %s6092_s5 = inlined_call_operand.vmem [shape: bf16[5,256,128], index: 5, kind: input, shape index: {}]   ;;  %s6093_s6 = inlined_call_operand.vmem [shape: f32[1,128], index: 6, kind: input, shape index: {}]   ;;  %s6094_s7 = inlined_call_operand.hbm [shape: bf16[5,16,16], index: 7, kind: input, shape index: {}]   ;;  %s6095_s8 = inlined_call_operand.hbm [shape: bf16[5,128,128], index: 8, kind: input, shape index: {}]   ;;  %s6096_s9 = inlined_call_operand.vmem [shape: f32[1,128], index: 9, kind: input, shape index: {}]   ;;  %s6097_s10 = inlined_call_operand.vmem [shape: bf16[8,2,16], index: 10, kind: input, shape index: {}]   ;;  %s6098_s11 = inlined_call_operand.hbm [shape: bf16[8,128,128], index: 11, kind: input, shape index: {}]   ;;  %s6099_s12 = inlined_call_operand.vmem [shape: f32[1,128], index: 12, kind: input, shape index: {}]   ;;  %s6100_s13 = inlined_call_operand.hbm [shape: f32[2,128], index: 13, kind: output, shape index: {}]  }
   0x1   :  { %19 = vsyncpa [#allocation6], 0 }
   0x2   :  { %20 = vsyncpa [#allocation9], 0  ;;  %s41_s27 = sshll.u32 %s6089_s2, 4  ;;  %s42_s27 = int_to_ptr.hbm [resolvable:$true] %s41_s27 }
   0x3   :  { %21 = vsyncpa [#allocation4], 0  ;;  %s5326_s28 = smov [#allocation5]   ;;  %s5327_s30 = smov 128  }
   0x4   :  { %s43_s29 = sshll.u32 %s5326_s28, 4  ;;  %s5328_s14 = smov 8   ;;  %s44_s29 = int_to_ptr.vmem [resolvable:$true] %s43_s29 }
   0x5   :  { %49 = dma.hbm_to_vmem [thread:$0]  %s42_s27, 7680, %s44_s29, [#allocation6], %s5327_s30, %s5327_s30, %s5328_s14  }
   0x6   :  { %s75_s17 = sshll.u32 %s6095_s8, 4  ;;  %s5329_s18 = smov [#allocation8]   ;;  %s76_s17 = int_to_ptr.hbm [resolvable:$true] %s75_s17 }
   0x7   :  { %s77_s19 = sshll.u32 %s5329_s18, 4  ;;  %s28_s22 = sshll.u32 %s6088_s1, 4  ;;  %s78_s19 = int_to_ptr.vmem [resolvable:$true] %s77_s19  ;;  %s29_s22 = int_to_ptr.hbm [resolvable:$true] %s28_s22 }
   0x8   :  { %s5330_s2 = smov 64   ;;  %s5331_s23 = smov 4  }
   0x9   :  { %83 = dma.hbm_to_vmem [thread:$0]  %s76_s17, 5120, %s78_s19, [#allocation9], %s5330_s2, %s5330_s2, %s5331_s23  }
   0xa   :  { %s62_s26 = sshll.u32 %s6094_s7, 4  ;;  %s5332_s27 = smov [#allocation2]   ;;  %s63_s26 = int_to_ptr.hbm [resolvable:$true] %s62_s26 }
   0xb   :  { %s30_s28 = sshll.u32 %s5332_s27, 4  ;;  %s5333_s8 = smov [#allocation7]   ;;  %s31_s28 = int_to_ptr.vmem [resolvable:$true] %s30_s28 }
   0xc   :  { %36 = dma.hbm_to_vmem [thread:$0]  %s29_s22, 1280, %s31_s28, [#allocation3], %s5330_s2, %s5330_s2, %s5331_s23  }
   0xd   :  { %s64_s29 = sshll.u32 %s5333_s8, 4  ;;  %s92_s1 = sshll.u32 %s6098_s11, 4  ;;  %s65_s29 = int_to_ptr.vmem [resolvable:$true] %s64_s29  ;;  %s93_s1 = int_to_ptr.hbm [resolvable:$true] %s92_s1 }
   0xe   :  { %70 = dma.hbm_to_vmem [thread:$0]  %s63_s26, 640, %s65_s29, [#allocation6], %s5330_s2, %s5330_s2, %s5331_s23  }
   0xf   :  { %s5334_s15 = smov [#allocation10]  }
  0x10   :  { %s94_s16 = sshll.u32 %s5334_s15, 4  ;;  %s95_s16 = int_to_ptr.vmem [resolvable:$true] %s94_s16 }
  0x11   :  { %100 = dma.hbm_to_vmem [thread:$0]  %s93_s1, 8192, %s95_s16, [#allocation9], %s5330_s2, %s5330_s2, %s5331_s23  }
  0x12   :  { %5318 = dma.done.wait [#allocation3], 1280  }
  0x13   :  { %5319 = vsyncadd [#allocation3], 4294966016 }
  0x14   :  { %5320 = dma.done.wait [#allocation6], 8320  }
  0x15   :  { %5321 = vsyncadd [#allocation6], 4294958976 }
  0x16   :  { %5322 = dma.done.wait [#allocation9], 13312  }
  0x17   :  { %5323 = vsyncadd [#allocation9], 4294953984  ;;  %v5424_v0 = vld [vmem:[%s6087_s0 + $0x18] sm:$0xff]  ;;  %v5430_v1 = vld [vmem:[%s6087_s0 + $0x10] sm:$0xff]  ;;  %vm170_vm0 = vcmask 523264   ;;  %vm325_vm1 = vcmask 785408  }
  0x18   :  { %235 = vmatpush.bf16.msra.mxu1 %v5424_v0  ;;  %181 = vmatpush.bf16.msra.mxu0 %v5424_v0  ;;  %v3643_v2 = vld [vmem:[#allocation5 + $0xb0] sm:$0xf]  ;;  %v4876_v3 = vld [vmem:[#allocation5 + $0xb4] sm:$0xf0]  ;;  %v4875_v4 = vld [vmem:[#allocation5 + $0xb4] sm:$0xf] }
  0x19   :  { %v3645_v5 = vld [vmem:[#allocation5 + $0xb8] sm:$0xf0]  ;;  %v3644_v6 = vor.u32 %v4876_v3, %v3643_v2  ;;  %v3635_v8 = vld [vmem:[#allocation5 + $0xa0] sm:$0xf]  ;;  %v4874_v9 = vld [vmem:[#allocation5 + $0xa4] sm:$0xf0] }
  0x1a   :  { %v3648_v7 = vor.u32 %v4875_v4, %v3645_v5  ;;  %v4873_v10 = vld [vmem:[#allocation5 + $0xa4] sm:$0xf]  ;;  %v3637_v11 = vld [vmem:[#allocation5 + $0xa8] sm:$0xf0]  ;;  %v5437_v12 = vld [vmem:[%s6087_s0 + $0x8] sm:$0xff]  ;;  %v3636_v14 = vor.u32 %v4874_v9, %v3635_v8  ;;  %s5335_s19 = smov [#allocation11]  }
  0x1b   :  { %v3695_v13 = vld [vmem:[#allocation5 + $0x50] sm:$0xf]  ;;  %334 = vmatpush.bf16.msra.mxu2 %v3644_v6  ;;  %v3640_v15 = vor.u32 %v4873_v10, %v3637_v11  ;;  %v4862_v16 = vld [vmem:[#allocation5 + $0x54] sm:$0xf0]  ;;  %v4861_v17 = vld [vmem:[#allocation5 + $0x54] sm:$0xf] }
  0x1c   :  { %236 = vmatpush.bf16.msra.mxu1 %v5430_v1  ;;  %182 = vmatpush.bf16.msra.mxu0 %v5430_v1  ;;  %v3697_v18 = vld [vmem:[#allocation5 + $0x58] sm:$0xf0]  ;;  %v3627_v19 = vld [vmem:[#allocation5 + $0x90] sm:$0xf]  ;;  %v4872_v20 = vld [vmem:[#allocation5 + $0x94] sm:$0xf0]  ;;  %v3696_v24 = vor.u32 %v4862_v16, %v3695_v13 }
  0x1d   :  { %353 = vmatpush.bf16.msra.mxu3 %v3648_v7  ;;  %v4871_v21 = vld [vmem:[#allocation5 + $0x94] sm:$0xf]  ;;  %v3629_v22 = vld [vmem:[#allocation5 + $0x98] sm:$0xf0]  ;;  %v3700_v25 = vor.u32 %v4861_v17, %v3697_v18  ;;  %v3687_v26 = vld [vmem:[#allocation5 + $0x40] sm:$0xf]  ;;  %v3628_v27 = vor.u32 %v4872_v20, %v3627_v19 }
  0x1e   :  { %v5444_v23 = vld [vmem:[%s6087_s0] sm:$0xff]  ;;  %v3632_v28 = vor.u32 %v4871_v21, %v3629_v22  ;;  %v4860_v29 = vld [vmem:[#allocation5 + $0x44] sm:$0xf0]  ;;  %v4859_v30 = vld [vmem:[#allocation5 + $0x44] sm:$0xf]  ;;  %s3551_s20 = sshll.u32 %s5335_s19, 4  ;;  %s3552_s20 = int_to_ptr.vmem [resolvable:$true] %s3551_s20 }
  0x1f   :  { %335 = vmatpush.bf16.msra.mxu2 %v3636_v14  ;;  %v3689_v31 = vld [vmem:[#allocation5 + $0x48] sm:$0xf0]  ;;  %v4863_v32 = vld [vmem:[#allocation2 + $0x10] sm:$0xff]  ;;  %v4849_v33 = vld [vmem:[#allocation2] sm:$0xff]  ;;  %v3688_v34 = vor.u32 %v4860_v29, %v3687_v26  ;;  %s3553_s0 = sshll.u32 %s6100_s13, 4  ;;  %s3554_s0 = int_to_ptr.hbm [resolvable:$true] %s3553_s0 }
  0x20   :  { %237 = vmatpush.bf16.msra.mxu1 %v5437_v12  ;;  %183 = vmatpush.bf16.msra.mxu0 %v5437_v12  ;;  %v3692_v35 = vor.u32 %v4859_v30, %v3689_v31  ;;  %v4864_v36 = vld [vmem:[#allocation2 + $0x18] sm:$0xff]  ;;  %v4850_v37 = vld [vmem:[#allocation2 + $0x8] sm:$0xff]  ;;  %v3619_v38 = vld [vmem:[#allocation5 + $0x80] sm:$0xf] }
  0x21   :  { %354 = vmatpush.bf16.msra.mxu3 %v3640_v15  ;;  %v4870_v39 = vld [vmem:[#allocation5 + $0x84] sm:$0xf0]  ;;  %v4869_v40 = vld [vmem:[#allocation5 + $0x84] sm:$0xf]  ;;  %v3621_v42 = vld [vmem:[#allocation5 + $0x88] sm:$0xf0] }
  0x22   :  { %v3620_v41 = vor.u32 %v4870_v39, %v3619_v38  ;;  %v3624_v43 = vor.u32 %v4869_v40, %v3621_v42  ;;  %v3679_v44 = vld [vmem:[#allocation5 + $0x30] sm:$0xf]  ;;  %v4858_v45 = vld [vmem:[#allocation5 + $0x34] sm:$0xf0]  ;;  %v4857_v46 = vld [vmem:[#allocation5 + $0x34] sm:$0xf] }
  0x23   :  { %336 = vmatpush.bf16.msra.mxu2 %v3628_v27  ;;  %v3680_v47 = vor.u32 %v4858_v45, %v3679_v44  ;;  %v3681_v48 = vld [vmem:[#allocation5 + $0x38] sm:$0xf0]  ;;  %v3611_v49 = vld [vmem:[#allocation5 + $0x70] sm:$0xf]  ;;  %v4868_v50 = vld [vmem:[#allocation5 + $0x74] sm:$0xf0] }
  0x24   :  { %238 = vmatpush.bf16.msra.mxu1 %v5444_v23  ;;  %184 = vmatpush.bf16.msra.mxu0 %v5444_v23  ;;  %v3684_v51 = vor.u32 %v4857_v46, %v3681_v48  ;;  %v3612_v52 = vor.u32 %v4868_v50, %v3611_v49  ;;  %v4867_v53 = vld [vmem:[#allocation5 + $0x74] sm:$0xf]  ;;  %v3613_v54 = vld [vmem:[#allocation5 + $0x78] sm:$0xf0]  ;;  %v3671_v55 = vld [vmem:[#allocation5 + $0x20] sm:$0xf] }
  0x25   :  { %355 = vmatpush.bf16.msra.mxu3 %v3632_v28  ;;  %v3616_v56 = vor.u32 %v4867_v53, %v3613_v54  ;;  %v4856_v57 = vld [vmem:[#allocation5 + $0x24] sm:$0xf0]  ;;  %v4855_v58 = vld [vmem:[#allocation5 + $0x24] sm:$0xf]  ;;  %v3673_v59 = vld [vmem:[#allocation5 + $0x28] sm:$0xf0] }
  0x26   :  { %v3672_v60 = vor.u32 %v4856_v57, %v3671_v55  ;;  %v3676_v61 = vor.u32 %v4855_v58, %v3673_v59  ;;  %v3603_v62 = vld [vmem:[#allocation5 + $0x60] sm:$0xf]  ;;  %v4866_v63 = vld [vmem:[#allocation5 + $0x64] sm:$0xf0]  ;;  %v4865_v2 = vld [vmem:[#allocation5 + $0x64] sm:$0xf] }
  0x27   :  { %3599 = vmatmul.msk.bf16.vlgmr.msra.gmra.mxu1 %vm170_vm0, %v4863_v32  ;;  %3589 = vmatmul.msk.bf16.vlgmr.msra.gmra.mxu0 %vm170_vm0, %v4849_v33  ;;  %v3604_v3 = vor.u32 %v4866_v63, %v3603_v62  ;;  %v3605_v4 = vld [vmem:[#allocation5 + $0x68] sm:$0xf0]  ;;  %v3663_v6 = vld [vmem:[#allocation5 + $0x10] sm:$0xf]  ;;  %v4854_v7 = vld [vmem:[#allocation5 + $0x14] sm:$0xf0] }
  0x28   :  { %438 = vmatpush.bf16.msrb.mxu0 %v3696_v24  ;;  %457 = vmatpush.bf16.msrb.mxu1 %v3700_v25  ;;  %v3608_v5 = vor.u32 %v4865_v2, %v3605_v4  ;;  %v4853_v8 = vld [vmem:[#allocation5 + $0x14] sm:$0xf]  ;;  %v3664_v9 = vor.u32 %v4854_v7, %v3663_v6  ;;  %v3665_v10 = vld [vmem:[#allocation5 + $0x18] sm:$0xf0]  ;;  %v3655_v13 = vld [vmem:[#allocation5] sm:$0xf] }
  0x29   :  { %337 = vmatpush.bf16.msra.mxu2 %v3620_v41  ;;  %356 = vmatpush.bf16.msra.mxu3 %v3624_v43  ;;  %v3668_v11 = vor.u32 %v4853_v8, %v3665_v10  ;;  %v4852_v14 = vld [vmem:[#allocation5 + $0x4] sm:$0xf0]  ;;  %v4851_v15 = vld [vmem:[#allocation5 + $0x4] sm:$0xf]  ;;  %v3657_v17 = vld [vmem:[#allocation5 + $0x8] sm:$0xf0] }
  0x2a   :  { %v3656_v16 = vor.u32 %v4852_v14, %v3655_v13  ;;  %v3660_v18 = vor.u32 %v4851_v15, %v3657_v17  ;;  %v4877_v32 = vld [vmem:[#allocation2 + $0x20] sm:$0xff]  ;;  %v4891_v33 = vld [vmem:[#allocation2 + $0x30] sm:$0xff]  ;;  %v3759_v40 = vld [vmem:[#allocation5 + $0x118] sm:$0xf0] }
  0x2b   :  { %v4889_v38 = vld [vmem:[#allocation5 + $0x114] sm:$0xf]  ;;  %v3819_v41 = vld [vmem:[#allocation5 + $0x170] sm:$0xf]  ;;  %v4904_v42 = vld [vmem:[#allocation5 + $0x174] sm:$0xf0] }
  0x2c   :  { %439 = vmatpush.bf16.msrb.mxu0 %v3688_v34  ;;  %458 = vmatpush.bf16.msrb.mxu1 %v3692_v35  ;;  %v4878_v34 = vld [vmem:[#allocation2 + $0x28] sm:$0xff]  ;;  %v4892_v35 = vld [vmem:[#allocation2 + $0x38] sm:$0xff]  ;;  %v3762_v43 = vor.u32 %v4889_v38, %v3759_v40  ;;  %v3820_v44 = vor.u32 %v4904_v42, %v3819_v41  ;;  %v3749_v45 = vld [vmem:[#allocation5 + $0x100] sm:$0xf] }
  0x2d   :  { %338 = vmatpush.bf16.msra.mxu2 %v3612_v52  ;;  %357 = vmatpush.bf16.msra.mxu3 %v3616_v56  ;;  %v4888_v46 = vld [vmem:[#allocation5 + $0x104] sm:$0xf0]  ;;  %v3751_v49 = vld [vmem:[#allocation5 + $0x108] sm:$0xf0]  ;;  %v3741_v54 = vld [vmem:[#allocation5 + $0xf0] sm:$0xf] }
  0x2e   :  { %v3750_v48 = vor.u32 %v4888_v46, %v3749_v45  ;;  %v4902_v52 = vld [vmem:[#allocation5 + $0x164] sm:$0xf0]  ;;  %v4886_v55 = vld [vmem:[#allocation5 + $0xf4] sm:$0xf0]  ;;  %v4885_v56 = vld [vmem:[#allocation5 + $0xf4] sm:$0xf] }
  0x2f   :  { %v3742_v57 = vor.u32 %v4886_v55, %v3741_v54  ;;  %v3743_v58 = vld [vmem:[#allocation5 + $0xf8] sm:$0xf0]  ;;  %v3803_v59 = vld [vmem:[#allocation5 + $0x150] sm:$0xf]  ;;  %v4884_v4 = vld [vmem:[#allocation5 + $0xe4] sm:$0xf0] }
  0x30   :  { %440 = vmatpush.bf16.msrb.mxu0 %v3680_v47  ;;  %459 = vmatpush.bf16.msrb.mxu1 %v3684_v51  ;;  %v4887_v47 = vld [vmem:[#allocation5 + $0x104] sm:$0xf]  ;;  %v3811_v51 = vld [vmem:[#allocation5 + $0x160] sm:$0xf]  ;;  %v3746_v63 = vor.u32 %v4885_v56, %v3743_v58  ;;  %v3735_v7 = vld [vmem:[#allocation5 + $0xe8] sm:$0xf0] }
  0x31   :  { %339 = vmatpush.bf16.msra.mxu2 %v3604_v3  ;;  %358 = vmatpush.bf16.msra.mxu3 %v3608_v5  ;;  %v3754_v50 = vor.u32 %v4887_v47, %v3751_v49  ;;  %v3812_v53 = vor.u32 %v4902_v52, %v3811_v51  ;;  %v3733_v3 = vld [vmem:[#allocation5 + $0xe0] sm:$0xf]  ;;  %v4883_v5 = vld [vmem:[#allocation5 + $0xe4] sm:$0xf]  ;;  %v4898_v10 = vld [vmem:[#allocation5 + $0x144] sm:$0xf0] }
  0x32   :  { %v3734_v6 = vor.u32 %v4884_v4, %v3733_v3  ;;  %v3738_v8 = vor.u32 %v4883_v5, %v3735_v7  ;;  %v3725_v15 = vld [vmem:[#allocation5 + $0xd0] sm:$0xf]  ;;  %v4881_v17 = vld [vmem:[#allocation5 + $0xd4] sm:$0xf]  ;;  %v3821_v45 = vld [vmem:[#allocation5 + $0x178] sm:$0xf0] }
  0x33   :  { %v4899_v52 = vld [vmem:[#allocation5 + $0x154] sm:$0xf]  ;;  %v4897_v56 = vld [vmem:[#allocation5 + $0x144] sm:$0xf] }
  0x34   :  { %441 = vmatpush.bf16.msrb.mxu0 %v3672_v60  ;;  %460 = vmatpush.bf16.msrb.mxu1 %v3676_v61  ;;  %v4900_v60 = vld [vmem:[#allocation5 + $0x154] sm:$0xf0] }
  0x35   :  { %499 = vmatpush.bf16.msrb.mxu2 %v5424_v0  ;;  %v3804_v2 = vor.u32 %v4900_v60, %v3803_v59  ;;  %v3789_v59 = vld [vmem:[#allocation5 + $0x138] sm:$0xf0] }
  0x37   :  { %3600 = vmatmul.msk.bf16.gmra.mxu1 %vm170_vm0, %v4864_v36  ;;  %3590 = vmatmul.msk.bf16.gmra.mxu0 %vm170_vm0, %v4850_v37  ;;  %v3757_v36 = vld [vmem:[#allocation5 + $0x110] sm:$0xf]  ;;  %v4890_v37 = vld [vmem:[#allocation5 + $0x114] sm:$0xf0] }
  0x38   :  { %442 = vmatpush.bf16.msrb.mxu0 %v3664_v9  ;;  %461 = vmatpush.bf16.msrb.mxu1 %v3668_v11  ;;  %v3758_v39 = vor.u32 %v4890_v37, %v3757_v36  ;;  %v3795_v9 = vld [vmem:[#allocation5 + $0x140] sm:$0xf]  ;;  %v4894_v36 = vld [vmem:[#allocation5 + $0x124] sm:$0xf0] }
  0x39   :  { %500 = vmatpush.bf16.msrb.mxu2 %v5430_v1  ;;  %v3796_v14 = vor.u32 %v4898_v10, %v3795_v9 }
  0x3a   :  { %597 = vmatpush.bf16.msrb.mxu3 %v3758_v39 }
  0x3c   :  { %443 = vmatpush.bf16.msrb.mxu0 %v3656_v16  ;;  %462 = vmatpush.bf16.msrb.mxu1 %v3660_v18  ;;  %v4882_v16 = vld [vmem:[#allocation5 + $0xd4] sm:$0xf0] }
  0x3d   :  { %501 = vmatpush.bf16.msrb.mxu2 %v5437_v12 }
  0x3e   :  { %598 = vmatpush.bf16.msrb.mxu3 %v3750_v48 }
  0x40   :  { %666 = vmatpush.bf16.msra.mxu1 %v5424_v0  ;;  %616 = vmatpush.bf16.msra.mxu0 %v3762_v43 }
  0x41   :  { %502 = vmatpush.bf16.msrb.mxu2 %v5444_v23 }
  0x42   :  { %599 = vmatpush.bf16.msrb.mxu3 %v3742_v57  ;;  %v3797_v57 = vld [vmem:[#allocation5 + $0x148] sm:$0xf0] }
  0x43   :  { %v3800_v58 = vor.u32 %v4897_v56, %v3797_v57  ;;  %v3841_v57 = vld [vmem:[#allocation5 + $0x180] sm:$0xf] }
  0x44   :  { %667 = vmatpush.bf16.msra.mxu1 %v5430_v1  ;;  %617 = vmatpush.bf16.msra.mxu0 %v3754_v50  ;;  %v4901_v50 = vld [vmem:[#allocation5 + $0x164] sm:$0xf] }
  0x46   :  { %600 = vmatpush.bf16.msrb.mxu3 %v3734_v6 }
  0x48   :  { %668 = vmatpush.bf16.msra.mxu1 %v5437_v12  ;;  %618 = vmatpush.bf16.msra.mxu0 %v3746_v63  ;;  %v3781_v63 = vld [vmem:[#allocation5 + $0x128] sm:$0xf0] }
  0x4c   :  { %669 = vmatpush.bf16.msra.mxu1 %v5444_v23  ;;  %619 = vmatpush.bf16.msra.mxu0 %v3738_v8 }
  0xa4   :  { %v240_v19 = vpop.f32.mrf.mxu1  ;;  %v186_v20 = vpop.f32.mrf.mxu0 }
  0xac   :  { %v242_v21 = vpop.f32.mrf.mxu1  ;;  %v188_v22 = vpop.f32.mrf.mxu0 }
  0xad   :  { %v250_v24 = vpack.c.bf16 %v242_v21, %v240_v19  ;;  %v196_v25 = vpack.c.bf16 %v188_v22, %v186_v20  ;;  %v3726_v20 = vor.u32 %v4882_v16, %v3725_v15  ;;  %v3727_v21 = vld [vmem:[#allocation5 + $0xd8] sm:$0xf0]  ;;  %v3787_v22 = vld [vmem:[#allocation5 + $0x130] sm:$0xf]  ;;  %v4918_v16 = vld [vmem:[#allocation5 + $0x1d4] sm:$0xf0] }
  0xae   :  { %v3881_v15 = vld [vmem:[#allocation5 + $0x1d0] sm:$0xf] }
  0xaf   :  { %3649 = vmatmul.msk.bf16.vlgmr.msra.gmra.mxu2 %vm325_vm1, %v250_v24  ;;  %3651 = vmatmul.msk.bf16.vlgmr.msra.gmra.mxu3 %vm325_vm1, %v250_v24  ;;  %v4896_v24 = vld [vmem:[#allocation5 + $0x134] sm:$0xf0] }
  0xb0   :  { %3701 = vmatmul.msk.bf16.vlgmr.msrb.gmra.mxu0 %vm325_vm1, %v196_v25  ;;  %3703 = vmatmul.msk.bf16.vlgmr.msrb.gmra.mxu1 %vm325_vm1, %v196_v25  ;;  %v3730_v25 = vor.u32 %v4881_v17, %v3727_v21  ;;  %v4917_v17 = vld [vmem:[#allocation5 + $0x1d4] sm:$0xf]  ;;  %v3883_v21 = vld [vmem:[#allocation5 + $0x1d8] sm:$0xf0] }
  0xb1   :  { %764 = vmatpush.bf16.msra.mxu2 %v3820_v44  ;;  %601 = vmatpush.bf16.msrb.mxu3 %v3726_v20  ;;  %v4903_v44 = vld [vmem:[#allocation5 + $0x174] sm:$0xf]  ;;  %v3882_v20 = vor.u32 %v4918_v16, %v3881_v15 }
  0xb2   :  { %620 = vmatpush.bf16.msra.mxu0 %v3730_v25  ;;  %v3824_v48 = vor.u32 %v4903_v44, %v3821_v45  ;;  %v4916_v25 = vld [vmem:[#allocation5 + $0x1c4] sm:$0xf0]  ;;  %v3859_v45 = vld [vmem:[#allocation5 + $0x1a8] sm:$0xf0] }
  0xb3   :  { %931 = vmatpush.bf16.msrb.mxu1 %v3882_v20  ;;  %v975_v20 = vld [vmem:[%s6090_s3] sm:$0x3] }
  0xb4   :  { %v245_v26 = vpop.f32.mrf.mxu1  ;;  %v191_v27 = vpop.f32.mrf.mxu0 }
  0xb5   :  { %765 = vmatpush.bf16.msra.mxu2 %v3812_v53  ;;  %v3805_v53 = vld [vmem:[#allocation5 + $0x158] sm:$0xf0] }
  0xb6   :  { %v3808_v54 = vor.u32 %v4899_v52, %v3805_v53  ;;  %v4910_v52 = vld [vmem:[#allocation5 + $0x194] sm:$0xf0]  ;;  %v4909_v53 = vld [vmem:[#allocation5 + $0x194] sm:$0xf] }
  0xb9   :  { %766 = vmatpush.bf16.msra.mxu2 %v3804_v2 }
  0xbc   :  { %v247_v28 = vpop.f32.mrf.mxu1  ;;  %v193_v29 = vpop.f32.mrf.mxu0 }
  0xbd   :  { %v251_v30 = vpack.c.bf16 %v247_v28, %v245_v26  ;;  %v197_v31 = vpack.c.bf16 %v193_v29, %v191_v27  ;;  %767 = vmatpush.bf16.msra.mxu2 %v3796_v14  ;;  %v3788_v26 = vor.u32 %v4896_v24, %v3787_v22  ;;  %v3717_v29 = vld [vmem:[#allocation5 + $0xc0] sm:$0xf]  ;;  %v4906_v14 = vld [vmem:[#allocation2 + $0x48] sm:$0xff]  ;;  %v3886_v22 = vor.u32 %v4917_v17, %v3883_v21  ;;  %v4944_v21 = vld [vmem:[%s6092_s5 + $0xb8] sm:$0xff] }
  0xbe   :  { %v3873_v24 = vld [vmem:[#allocation5 + $0x1c0] sm:$0xf] }
  0xbf   :  { %3650 = vmatmul.msk.bf16.gmra.mxu2 %vm325_vm1, %v251_v30  ;;  %3652 = vmatmul.msk.bf16.gmra.mxu3 %vm325_vm1, %v251_v30  ;;  %v4880_v30 = vld [vmem:[#allocation5 + $0xc4] sm:$0xf0] }
  0xc0   :  { %3702 = vmatmul.msk.bf16.gmra.mxu0 %vm325_vm1, %v197_v31  ;;  %3704 = vmatmul.msk.bf16.gmra.mxu1 %vm325_vm1, %v197_v31  ;;  %v4879_v31 = vld [vmem:[#allocation5 + $0xc4] sm:$0xf] }
  0xc1   :  { %768 = vmatpush.bf16.msra.mxu2 %v3788_v26  ;;  %v4915_v26 = vld [vmem:[#allocation5 + $0x1c4] sm:$0xf] }
  0xcf   :  { %3713 = vmatmul.msk.bf16.vlgmr.msrb.gmra.mxu2 %vm170_vm0, %v4877_v32  ;;  %v3718_v32 = vor.u32 %v4880_v30, %v3717_v29  ;;  %v3874_v29 = vor.u32 %v4916_v25, %v3873_v24  ;;  %v3875_v30 = vld [vmem:[#allocation5 + $0x1c8] sm:$0xf0]  ;;  %v5528_v25 = vperm.slane %v975_v20, 0 }
  0xd0   :  { %3775 = vmatmul.msk.bf16.vlgmr.msra.gmra.mxu1 %vm170_vm0, %v4891_v33  ;;  %v3719_v33 = vld [vmem:[#allocation5 + $0xc8] sm:$0xf0] }
  0xd1   :  { %602 = vmatpush.bf16.msrb.mxu3 %v3718_v32  ;;  %932 = vmatpush.bf16.msrb.mxu1 %v3874_v29  ;;  %v4943_v29 = vld [vmem:[%s6092_s5 + $0xb0] sm:$0xff] }
  0xd5   :  { %783 = vmatpush.bf16.msra.mxu3 %v3824_v48 }
  0xdf   :  { %3714 = vmatmul.msk.bf16.gmra.mxu2 %vm170_vm0, %v4878_v34  ;;  %v3722_v34 = vor.u32 %v4879_v31, %v3719_v33  ;;  %v3878_v31 = vor.u32 %v4915_v26, %v3875_v30  ;;  %v3865_v33 = vld [vmem:[#allocation5 + $0x1b0] sm:$0xf] }
  0xe0   :  { %3776 = vmatmul.msk.bf16.gmra.mxu1 %vm170_vm0, %v4892_v35  ;;  %v3779_v35 = vld [vmem:[#allocation5 + $0x120] sm:$0xf] }
  0xe1   :  { %v3780_v39 = vor.u32 %v4894_v36, %v3779_v35  ;;  %621 = vmatpush.bf16.msra.mxu0 %v3722_v34  ;;  %v4914_v34 = vld [vmem:[#allocation5 + $0x1b4] sm:$0xf0]  ;;  %v4913_v35 = vld [vmem:[#allocation5 + $0x1b4] sm:$0xf] }
  0xe2   :  { %v3866_v36 = vor.u32 %v4914_v34, %v3865_v33  ;;  %v4942_v34 = vld [vmem:[%s6092_s5 + $0xa8] sm:$0xff] }
  0xe3   :  { %769 = vmatpush.bf16.msra.mxu2 %v3780_v39  ;;  %v3867_v39 = vld [vmem:[#allocation5 + $0x1b8] sm:$0xf0] }
  0xe4   :  { %933 = vmatpush.bf16.msrb.mxu1 %v3866_v36  ;;  %v5539_v36 = vperm.slane %v975_v20, 1 }
  0xe5   :  { %833 = vmatpush.bf16.msrb.mxu0 %v5424_v0  ;;  %v3813_v0 = vld [vmem:[#allocation5 + $0x168] sm:$0xf0] }
  0xe6   :  { %v3816_v51 = vor.u32 %v4901_v50, %v3813_v0 }
  0xe7   :  { %950 = vmatpush.bf16.msrb.mxu2 %v3886_v22 }
  0xe8   :  { %784 = vmatpush.bf16.msra.mxu3 %v3816_v51  ;;  %v3849_v51 = vld [vmem:[#allocation5 + $0x190] sm:$0xf] }
  0xe9   :  { %834 = vmatpush.bf16.msrb.mxu0 %v5430_v1 }
  0xeb   :  { %951 = vmatpush.bf16.msrb.mxu2 %v3878_v31 }
  0xec   :  { %785 = vmatpush.bf16.msra.mxu3 %v3808_v54  ;;  %v3850_v54 = vor.u32 %v4910_v52, %v3849_v51  ;;  %v4940_v52 = vld [vmem:[%s6092_s5 + $0x98] sm:$0xff] }
  0xed   :  { %835 = vmatpush.bf16.msrb.mxu0 %v5437_v12  ;;  %v4895_v12 = vld [vmem:[#allocation5 + $0x134] sm:$0xf] }
  0xf0   :  { %786 = vmatpush.bf16.msra.mxu3 %v3800_v58  ;;  %v4908_v58 = vld [vmem:[#allocation5 + $0x184] sm:$0xf0] }
  0xf1   :  { %836 = vmatpush.bf16.msrb.mxu0 %v5444_v23 }
 0x12d   :  { %v445_v61 = vpop.f32.mrf.mxu0  ;;  %v464_v62 = vpop.f32.mrf.mxu1 }
 0x132   :  { %v341_v11 = vpop.f32.mrf.mxu2  ;;  %v360_v13 = vpop.f32.mrf.mxu3 }
 0x133   :  { %v5473_v18 = vadd.f32 %v445_v61, %v341_v11  ;;  %v5475_v19 = vadd.f32 %v464_v62, %v360_v13  ;;  %v3792_v61 = vor.u32 %v4895_v12, %v3789_v59  ;;  %v4893_v62 = vld [vmem:[#allocation5 + $0x124] sm:$0xf]  ;;  %v4905_v13 = vld [vmem:[#allocation2 + $0x40] sm:$0xff]  ;;  %v3842_v59 = vor.u32 %v4908_v58, %v3841_v57 }
 0x134   :  { %v3784_v3 = vor.u32 %v4893_v62, %v3781_v63  ;;  %v4907_v12 = vld [vmem:[#allocation5 + $0x184] sm:$0xf] }
 0x135   :  { %v5477_v27 = vpop.f32.mrf.mxu1  ;;  %v5479_v28 = vpop.f32.mrf.mxu0  ;;  %787 = vmatpush.bf16.msra.mxu3 %v3792_v61 }
 0x139   :  { %788 = vmatpush.bf16.msra.mxu3 %v3784_v3 }
 0x13a   :  { %v5481_v37 = vpop.f32.mrf.mxu2  ;;  %v5483_v38 = vpop.f32.mrf.mxu3 }
 0x13d   :  { %v469_v40 = vpop.f32.mrf.mxu1  ;;  %v450_v41 = vpop.f32.mrf.mxu0 }
 0x142   :  { %v346_v42 = vpop.f32.mrf.mxu2  ;;  %v365_v43 = vpop.f32.mrf.mxu3 }
 0x143   :  { %v5487_v46 = vadd.f32 %v450_v41, %v346_v42  ;;  %v5489_v47 = vadd.f32 %v469_v40, %v365_v43  ;;  %v3870_v40 = vor.u32 %v4913_v35, %v3867_v39  ;;  %v3857_v41 = vld [vmem:[#allocation5 + $0x1a0] sm:$0xf]  ;;  %v4912_v42 = vld [vmem:[#allocation5 + $0x1a4] sm:$0xf0]  ;;  %v4911_v43 = vld [vmem:[#allocation5 + $0x1a4] sm:$0xf] }
 0x144   :  { %v3858_v44 = vor.u32 %v4912_v42, %v3857_v41  ;;  %v3862_v48 = vor.u32 %v4911_v43, %v3859_v45 }
 0x145   :  { %v5492_v49 = vpop.f32.mrf.mxu1  ;;  %v5507_v32 = vpop.f32.mrf.mxu0  ;;  %952 = vmatpush.bf16.msrb.mxu2 %v3870_v40 }
 0x146   :  { %934 = vmatpush.bf16.msrb.mxu1 %v3858_v44 }
 0x149   :  { %953 = vmatpush.bf16.msrb.mxu2 %v3862_v48 }
 0x14a   :  { %v5495_v1 = vpop.f32.mrf.mxu2  ;;  %935 = vmatpush.bf16.msrb.mxu1 %v3850_v54 }
 0x14d   :  { %v671_v55 = vpop.f32.mrf.mxu1 }
 0x14e   :  { %936 = vmatpush.bf16.msrb.mxu1 %v3842_v59  ;;  %v453_v59 = vadd.f32 %v5507_v32, %v5495_v1 }
 0x152   :  { %v504_v60 = vpop.f32.mrf.mxu2 }
 0x155   :  { %v673_v2 = vpop.f32.mrf.mxu1 }
 0x156   :  { %v681_v23 = vpack.c.bf16 %v673_v2, %v671_v55  ;;  %v3851_v55 = vld [vmem:[#allocation5 + $0x198] sm:$0xf0] }
 0x157   :  { %v3854_v56 = vor.u32 %v4909_v53, %v3851_v55 }
 0x158   :  { %3825 = vmatmul.msk.bf16.vlgmr.msra.gmra.mxu2 %vm325_vm1, %v681_v23 }
 0x159   :  { %954 = vmatpush.bf16.msrb.mxu2 %v3854_v56 }
 0x15a   :  { %v506_v4 = vpop.f32.mrf.mxu2 }
 0x15b   :  { %v514_v5 = vpack.c.bf16 %v506_v4, %v504_v60  ;;  %v3843_v60 = vld [vmem:[#allocation5 + $0x188] sm:$0xf0] }
 0x15c   :  { %v3846_v61 = vor.u32 %v4907_v12, %v3843_v60 }
 0x15d   :  { %3763 = vmatmul.msk.bf16.vlgmr.msrb.gmra.mxu3 %vm325_vm1, %v514_v5  ;;  %3765 = vmatmul.msk.bf16.vlgmr.msra.gmra.mxu0 %vm325_vm1, %v514_v5  ;;  %v676_v6 = vpop.f32.mrf.mxu1 }
 0x15e   :  { %955 = vmatpush.bf16.msrb.mxu2 %v3846_v61 }
 0x162   :  { %v509_v7 = vpop.f32.mrf.mxu2  ;;  %1388 = vmatpush.bf16.msra.mxu2 %v4944_v21 }
 0x165   :  { %v678_v8 = vpop.f32.mrf.mxu1 }
 0x166   :  { %v682_v9 = vpack.c.bf16 %v678_v8, %v676_v6  ;;  %v5519_v8 = vpop.f32.mrf.mxu3  ;;  %1389 = vmatpush.bf16.msra.mxu2 %v4943_v29 }
 0x168   :  { %3826 = vmatmul.msk.bf16.gmra.mxu2 %vm325_vm1, %v682_v9 }
 0x16a   :  { %v511_v10 = vpop.f32.mrf.mxu2  ;;  %1390 = vmatpush.bf16.msra.mxu2 %v4942_v34 }
 0x16b   :  { %v515_v11 = vpack.c.bf16 %v511_v10, %v509_v7 }
 0x16d   :  { %3764 = vmatmul.msk.bf16.gmra.mxu3 %vm325_vm1, %v515_v11  ;;  %3766 = vmatmul.msk.bf16.gmra.mxu0 %vm325_vm1, %v515_v11 }
 0x17d   :  { %3827 = vmatmul.msk.bf16.vlgmr.msra.gmra.mxu3 %vm325_vm1, %v681_v23  ;;  %3837 = vmatmul.msk.bf16.vlgmr.msrb.gmra.mxu0 %vm170_vm0, %v4905_v13 }
 0x18d   :  { %3828 = vmatmul.msk.bf16.gmra.mxu3 %vm325_vm1, %v682_v9  ;;  %3838 = vmatmul.msk.bf16.gmra.mxu0 %vm170_vm0, %v4906_v14 }
 0x1da   :  { %v623_v50 = vpop.f32.mrf.mxu0 }
 0x1db   :  { %v634_v0 = vadd.f32 %v623_v50, %v5475_v19  ;;  %v771_v10 = vpop.f32.mrf.mxu2 }
 0x1e2   :  { %v625_v62 = vpop.f32.mrf.mxu0 }
 0x1e3   :  { %v773_v13 = vpop.f32.mrf.mxu2 }
 0x1ea   :  { %v628_v63 = vpop.f32.mrf.mxu0 }
 0x1eb   :  { %v5511_v19 = vadd.f32 %v628_v63, %v5489_v47  ;;  %v604_v47 = vpop.f32.mrf.mxu3  ;;  %v776_v15 = vpop.f32.mrf.mxu2 }
 0x1ec   :  { %v633_v16 = vadd.f32 %v604_v47, %v5473_v18  ;;  %v448_v18 = vadd.f32 %v5479_v28, %v5481_v37  ;;  %v4941_v28 = vld [vmem:[%s6092_s5 + $0xa0] sm:$0xff]  ;;  %v467_v37 = vadd.f32 %v5477_v27, %v5483_v38 }
 0x1ed   :  { %1391 = vmatpush.bf16.msra.mxu2 %v4941_v28 }
 0x1ee   :  { %v800_v24 = vadd.f32 %v771_v10, %v633_v16  ;;  %v636_v50 = vadd.f32 %v625_v62, %v467_v37 }
 0x1f1   :  { %1392 = vmatpush.bf16.msra.mxu2 %v4940_v52 }
 0x1f2   :  { %v5513_v2 = vpop.f32.mrf.mxu0 }
 0x1f3   :  { %v606_v9 = vpop.f32.mrf.mxu3  ;;  %v778_v22 = vpop.f32.mrf.mxu2 }
 0x1f4   :  { %v635_v31 = vadd.f32 %v606_v9, %v448_v18 }
 0x1f6   :  { %v802_v41 = vadd.f32 %v773_v13, %v635_v31  ;;  %v4937_v13 = vld [vmem:[%s6092_s5 + $0x80] sm:$0xff] }
 0x1fa   :  { %v838_v23 = vpop.f32.mrf.mxu0 }
 0x1fb   :  { %v609_v11 = vpop.f32.mrf.mxu3 }
 0x202   :  { %v840_v3 = vpop.f32.mrf.mxu0 }
 0x203   :  { %v848_v4 = vpack.c.bf16 %v840_v3, %v838_v23  ;;  %v611_v14 = vpop.f32.mrf.mxu3 }
 0x204   :  { %v639_v62 = vadd.f32 %v611_v14, %v453_v59 }
 0x205   :  { %3887 = vmatmul.msk.bf16.vlgmr.msrb.gmra.mxu1 %vm325_vm1, %v848_v4  ;;  %3889 = vmatmul.msk.bf16.vlgmr.msrb.gmra.mxu2 %vm325_vm1, %v848_v4  ;;  %v4938_v4 = vld [vmem:[%s6092_s5 + $0x88] sm:$0xff] }
 0x206   :  { %v806_v9 = vadd.f32 %v778_v22, %v639_v62 }
 0x20a   :  { %v843_v5 = vpop.f32.mrf.mxu0 }
 0x20b   :  { %v790_v17 = vpop.f32.mrf.mxu3 }
 0x20c   :  { %v801_v35 = vadd.f32 %v790_v17, %v634_v0  ;;  %v637_v0 = vadd.f32 %v609_v11, %v5487_v46  ;;  %v4939_v46 = vld [vmem:[%s6092_s5 + $0x90] sm:$0xff] }
 0x20d   :  { %1393 = vmatpush.bf16.msra.mxu2 %v4939_v46 }
 0x20e   :  { %v804_v27 = vadd.f32 %v776_v15, %v637_v0 }
 0x211   :  { %1394 = vmatpush.bf16.msra.mxu2 %v4938_v4 }
 0x212   :  { %v845_v6 = vpop.f32.mrf.mxu0 }
 0x213   :  { %v849_v7 = vpack.c.bf16 %v845_v6, %v843_v5  ;;  %v792_v39 = vpop.f32.mrf.mxu3 }
 0x214   :  { %v803_v53 = vadd.f32 %v792_v39, %v636_v50 }
 0x215   :  { %3888 = vmatmul.msk.bf16.gmra.mxu1 %vm325_vm1, %v849_v7  ;;  %3890 = vmatmul.msk.bf16.gmra.mxu2 %vm325_vm1, %v849_v7 }
 0x216   :  { %1395 = vmatpush.bf16.msra.mxu2 %v4937_v13 }
 0x21b   :  { %v795_v57 = vpop.f32.mrf.mxu3 }
 0x21c   :  { %v805_v6 = vadd.f32 %v795_v57, %v5511_v19  ;;  %v472_v19 = vadd.f32 %v5492_v49, %v5519_v8 }
 0x21e   :  { %v640_v21 = vadd.f32 %v5513_v2, %v472_v19 }
 0x223   :  { %v797_v16 = vpop.f32.mrf.mxu3 }
 0x224   :  { %v807_v29 = vadd.f32 %v797_v16, %v640_v21 }
 0x282   :  { %v938_v26 = vpop.f32.mrf.mxu1 }
 0x283   :  { %v967_v30 = vadd.f32 %v938_v26, %v800_v24 }
 0x285   :  { %v981_v33 = vadd.f32 %v5528_v25, %v967_v30 }
 0x287   :  { %v3891_v42 = vmul.f32 -1.442695, %v981_v33 }
 0x288   :  { %v957_v40 = vpop.f32.mrf.mxu2 }
 0x289   :  { %v968_v43 = vadd.f32 %v957_v40, %v801_v35  ;;  %5126 = vpow2.f32 %v3891_v42 }
 0x28a   :  { %v940_v44 = vpop.f32.mrf.mxu1 }
 0x28b   :  { %v982_v45 = vadd.f32 %v5539_v36, %v968_v43  ;;  %v969_v48 = vadd.f32 %v940_v44, %v802_v41 }
 0x28d   :  { %v983_v51 = vadd.f32 %v5528_v25, %v969_v48  ;;  %v3892_v54 = vmul.f32 -1.442695, %v982_v45 }
 0x28f   :  { %v3893_v55 = vmul.f32 -1.442695, %v983_v51  ;;  %v5127_v12 = vpop.eup %5126 }
 0x290   :  { %v959_v56 = vpop.f32.mrf.mxu2  ;;  %v5559_v3 = vadd.f32 1.0, %v5127_v12 }
 0x291   :  { %5128 = vpow2.f32 %v3893_v55  ;;  %v970_v38 = vadd.f32 %v959_v56, %v803_v53 }
 0x292   :  { %v943_v58 = vpop.f32.mrf.mxu1  ;;  %5130 = vpow2.f32 %v3892_v54  ;;  %v1032_v48 = vand.u32 2147483648, %v5559_v3  ;;  %vm1026_vm2 = vweird.f32 %v5559_v3 }
 0x293   :  { %v984_v60 = vadd.f32 %v5539_v36, %v970_v38  ;;  %v971_v61 = vadd.f32 %v943_v58, %v804_v27  ;;  %v1030_v27 = vand.u32 2147483647, %v5559_v3 }
 0x294   :  { %v5619_v38 = vor.u32 1.1754944e-38, %v1032_v48 }
 0x295   :  { %v3894_v63 = vmul.f32 -1.442695, %v984_v60  ;;  %v985_v23 = vadd.f32 %v5528_v25, %v971_v61  ;;  %vm5658_vm10 = vcmp.eq.f32.partialorder %v1030_v27, 8.507059e+37 }
 0x297   :  { %v5129_v5 = vpop.eup %5128  ;;  %5132 = vpow2.f32 %v3894_v63  ;;  %v3895_v1 = vmul.f32 -1.442695, %v985_v23 }
 0x298   :  { %v5565_v32 = vadd.f32 1.0, %v5129_v5  ;;  %v962_v7 = vpop.f32.mrf.mxu2  ;;  %v5131_v47 = vpop.eup %5130 }
 0x299   :  { %5134 = vpow2.f32 %v3895_v1  ;;  %v972_v10 = vadd.f32 %v962_v7, %v805_v6  ;;  %v5575_v17 = vadd.f32 1.0, %v5131_v47 }
 0x29a   :  { %5136 = vrcp.f32 %v5559_v3  ;;  %v945_v11 = vpop.f32.mrf.mxu1  ;;  %v1060_v57 = vand.u32 2147483647, %v5565_v32  ;;  %v1062_v59 = vand.u32 2147483648, %v5565_v32  ;;  %vm1056_vm4 = vweird.f32 %v5565_v32 }
 0x29b   :  { %5138 = vrcp.f32 %v5565_v32  ;;  %v986_v14 = vadd.f32 %v5539_v36, %v972_v10  ;;  %v973_v15 = vadd.f32 %v945_v11, %v806_v9  ;;  %v1047_v56 = vand.u32 2147483648, %v5575_v17  ;;  %v4933_v10 = vld [vmem:[%s6092_s5 + $0x68] sm:$0xff] }
 0x29c   :  { %vm5638_vm6 = vcmp.eq.f32.partialorder %v1060_v57, 8.507059e+37  ;;  %v1063_v11 = vor.u32 1.1754944e-38, %v1062_v59 }
 0x29d   :  { %v5133_v20 = vpop.eup %5132  ;;  %v3896_v22 = vmul.f32 -1.442695, %v986_v14  ;;  %v987_v24 = vadd.f32 %v5528_v25, %v973_v15  ;;  %v4950_v15 = vld [vmem:[%s6092_s5 + $0xe8] sm:$0xff] }
 0x29e   :  { %v5579_v18 = vadd.f32 1.0, %v5133_v20 }
 0x29f   :  { %v5135_v26 = vpop.eup %5134  ;;  %5140 = vpow2.f32 %v3896_v22  ;;  %v3897_v49 = vmul.f32 -1.442695, %v987_v24 }
 0x2a0   :  { %v5581_v8 = vpop.eup %5136  ;;  %5142 = vrcp.f32 %v5575_v17  ;;  %v5584_v30 = vadd.f32 1.0, %v5135_v26  ;;  %v964_v31 = vpop.f32.mrf.mxu2 }
 0x2a1   :  { %v5586_v33 = vpop.eup %5138  ;;  %5144 = vpow2.f32 %v3897_v49  ;;  %v974_v2 = vadd.f32 %v964_v31, %v807_v29  ;;  %v1022_v25 = vmul.f32 %v5581_v8, %v5559_v3  ;;  %vm1027_vm3 = vweird.f32 %v5581_v8  ;;  %v4924_v3 = vld [vmem:[%s6092_s5 + $0x20] sm:$0xff]  ;;  %v4929_v29 = vld [vmem:[%s6092_s5 + $0x48] sm:$0xff] }
 0x2a2   :  { %5146 = vrcp.f32 %v5584_v30  ;;  %v1052_v35 = vmul.f32 %v5586_v33, %v5565_v32  ;;  %vm1057_vm5 = vweird.f32 %v5586_v33  ;;  %v1090_v1 = vand.u32 2147483647, %v5584_v30  ;;  %vm5649_vm8 = vmor %vm1026_vm2, %vm1027_vm3 }
 0x2a3   :  { %5148 = vrcp.f32 %v5579_v18  ;;  %v988_v34 = vadd.f32 %v5539_v36, %v974_v2  ;;  %v1023_v44 = vsub.f32 1.0, %v1022_v25  ;;  %vm1086_vm7 = vweird.f32 %v5584_v30  ;;  %vm5666_vm11 = vmor %vm1056_vm4, %vm1057_vm5 }
 0x2a4   :  { %v1053_v37 = vsub.f32 1.0, %v1052_v35  ;;  %v1092_v9 = vand.u32 2147483648, %v5584_v30  ;;  %vm5677_vm12 = vcmp.eq.f32.partialorder %v1090_v1, 8.507059e+37  ;;  %vm1041_vm2 = vweird.f32 %v5575_v17 }
 0x2a5   :  { %v5141_v39 = vpop.eup %5140  ;;  %v3898_v40 = vmul.f32 -1.442695, %v988_v34  ;;  %v1024_v51 = vmul.f32 %v5581_v8, %v1023_v44 }
 0x2a6   :  { %v5595_v41 = vpop.eup %5142  ;;  %v5597_v42 = vadd.f32 1.0, %v5141_v39  ;;  %v1054_v53 = vmul.f32 %v5586_v33, %v1053_v37  ;;  %v1093_v31 = vor.u32 1.1754944e-38, %v1092_v9  ;;  %v4952_v9 = vld [vmem:[%s6092_s5 + $0xf8] sm:$0xff] }
 0x2a7   :  { %v5145_v43 = vpop.eup %5144  ;;  %5150 = vpow2.f32 %v3898_v40  ;;  %v1037_v0 = vmul.f32 %v5595_v41, %v5575_v17  ;;  %v1025_v62 = vadd.f32 %v5581_v8, %v1024_v51  ;;  %vm1042_vm14 = vweird.f32 %v5595_v41 }
 0x2a8   :  { %v5599_v28 = vpop.eup %5146  ;;  %5152 = vrcp.f32 %v5597_v42  ;;  %v5602_v45 = vadd.f32 1.0, %v5145_v43  ;;  %v1055_v4 = vadd.f32 %v5586_v33, %v1054_v53  ;;  %vm1101_vm15 = vweird.f32 %v5597_v42 }
 0x2a9   :  { %v5604_v36 = vpop.eup %5148  ;;  %v1082_v50 = vmul.f32 %v5599_v28, %v5584_v30  ;;  %v1038_v46 = vsub.f32 1.0, %v1037_v0  ;;  %vm1087_vm9 = vweird.f32 %v5599_v28  ;;  %v1029_v14 = vsel %vm5649_vm8, %v5581_v8, %v1025_v62  ;;  %v4928_v8 = vld [vmem:[%s6092_s5 + $0x40] sm:$0xff] }
 0x2aa   :  { %5154 = vrcp.f32 %v5602_v45  ;;  %v1067_v54 = vmul.f32 %v5604_v36, %v5579_v18  ;;  %v1122_v20 = vand.u32 2147483648, %v5602_v45  ;;  %v1120_v21 = vand.u32 2147483647, %v5602_v45  ;;  %vm5689_vm1 = vmor %vm1086_vm7, %vm1087_vm9 }
 0x2ab   :  { %v1083_v52 = vsub.f32 1.0, %v1082_v50  ;;  %v1039_v47 = vmul.f32 %v5595_v41, %v1038_v46  ;;  %v1059_v22 = vsel %vm5666_vm11, %v5586_v33, %v1055_v4  ;;  %v1107_v49 = vand.u32 2147483648, %v5597_v42 }
 0x2ac   :  { %v1068_v23 = vsub.f32 1.0, %v1067_v54  ;;  %vm1116_vm0 = vweird.f32 %v5602_v45  ;;  %v1064_v34 = vsel %vm5638_vm6, %v1063_v11, %v1059_v22  ;;  %vm1121_vm4 = vcmp.eq.f32.partialorder %v1120_v21, 8.507059e+37  ;;  %v4926_v11 = vld [vmem:[%s6092_s5 + $0x30] sm:$0xff]  ;;  %v4923_v21 = vld [vmem:[%s6092_s5 + $0x18] sm:$0xff] }
 0x2ad   :  { %v5151_v55 = vpop.eup %5150  ;;  %v1084_v60 = vmul.f32 %v5599_v28, %v1083_v52  ;;  %v1123_v30 = vor.u32 1.1754944e-38, %v1122_v20  ;;  %v1105_v35 = vand.u32 2147483647, %v5597_v42  ;;  %vm1072_vm6 = vweird.f32 %v5604_v36  ;;  %v4949_v20 = vld [vmem:[%s6092_s5 + $0xe0] sm:$0xff]  ;;  %v4930_v22 = vld [vmem:[%s6092_s5 + $0x50] sm:$0xff]  ;;  %v4955_v52 = vld [vmem:[%s6092_s5 + $0x108] sm:$0xff] }
 0x2ae   :  { %v5622_v58 = vpop.eup %5152  ;;  %v5624_v12 = vadd.f32 1.0, %v5151_v55  ;;  %v1069_v16 = vmul.f32 %v5604_v36, %v1068_v23  ;;  %v1034_v51 = vsel %vm5658_vm10, %v5619_v38, %v1029_v14  ;;  %v1040_v53 = vadd.f32 %v5595_v41, %v1039_v47  ;;  %v4932_v14 = vld [vmem:[%s6092_s5 + $0x60] sm:$0xff]  ;;  %v4986_v23 = vld [vmem:[%s6092_s5 + $0x1f8] sm:$0xff] }
 0x2af   :  { %v1097_v61 = vmul.f32 %v5622_v58, %v5597_v42  ;;  %v1085_v19 = vadd.f32 %v5599_v28, %v1084_v60  ;;  %vm1102_vm5 = vweird.f32 %v5622_v58  ;;  %vm1071_vm9 = vweird.f32 %v5579_v18 }
 0x2b0   :  { %v5155_v63 = vpop.eup %5154  ;;  %5156 = vrcp.f32 %v5624_v12  ;;  %v1070_v39 = vadd.f32 %v5604_v36, %v1069_v16  ;;  %v1135_v0 = vand.u32 2147483647, %v5624_v12  ;;  %vm5716_vm8 = vmor %vm1101_vm15, %vm1102_vm5  ;;  %v1077_v54 = vand.u32 2147483648, %v5579_v18  ;;  %v4931_v16 = vld [vmem:[%s6092_s5 + $0x58] sm:$0xff] }
 0x2b1   :  { %v1098_v5 = vsub.f32 1.0, %v1097_v61  ;;  %v1112_v6 = vmul.f32 %v5155_v63, %v5602_v45  ;;  %vm1117_vm13 = vweird.f32 %v5155_v63  ;;  %v1089_v2 = vsel %vm5689_vm1, %v5599_v28, %v1085_v19  ;;  %vm5731_vm11 = vmor %vm1071_vm9, %vm1072_vm6  ;;  %v4925_v19 = vld [vmem:[%s6092_s5 + $0x28] sm:$0xff] }
 0x2b2   :  { %vm1118_vm3 = vmor %vm1116_vm0, %vm1117_vm13  ;;  %v1094_v28 = vsel %vm5677_vm12, %v1093_v31, %v1089_v2  ;;  %v1137_v45 = vand.u32 2147483648, %v5624_v12  ;;  %vm1131_vm10 = vweird.f32 %v5624_v12  ;;  %v1075_v38 = vand.u32 2147483647, %v5579_v18  ;;  %v4919_v18 = vld [vmem:[%s6091_s4] sm:$0xff]  ;;  %v4946_v31 = vld [vmem:[%s6092_s5 + $0xc8] sm:$0xff] }
 0x2b3   :  { %v1113_v13 = vsub.f32 1.0, %v1112_v6  ;;  %v1099_v24 = vmul.f32 %v5622_v58, %v1098_v5  ;;  %v5737_v57 = vpack.c.bf16 %v1064_v34, %v1034_v51  ;;  %v1108_v46 = vor.u32 1.1754944e-38, %v1107_v49  ;;  %vm5754_vm0 = vmor %vm1041_vm2, %vm1042_vm14  ;;  %v4921_v49 = vld [vmem:[%s6092_s5 + $0x8] sm:$0xff]  ;;  %v4969_v2 = vld [vmem:[%s6092_s5 + $0x178] sm:$0xff] }
 0x2b4   :  { %v1138_v59 = vor.u32 1.1754944e-38, %v1137_v45  ;;  %vm1106_vm13 = vcmp.eq.f32.partialorder %v1105_v35, 8.507059e+37  ;;  %vm1136_vm15 = vcmp.eq.f32.partialorder %v1135_v0, 8.507059e+37  ;;  %v1074_v60 = vsel %vm5731_vm11, %v5604_v36, %v1070_v39  ;;  %v4961_v34 = vld [vmem:[%s6092_s5 + $0x138] sm:$0xff]  ;;  %v4967_v35 = vld [vmem:[%s6092_s5 + $0x168] sm:$0xff]  ;;  %v4966_v39 = vld [vmem:[%s6092_s5 + $0x160] sm:$0xff] }
 0x2b5   :  { %v1114_v26 = vmul.f32 %v5155_v63, %v1113_v13  ;;  %v1100_v44 = vadd.f32 %v5622_v58, %v1099_v24  ;;  %v1078_v4 = vor.u32 1.1754944e-38, %v1077_v54  ;;  %vm1152_vm1 = vcmask 261120   ;;  %v4951_v13 = vld [vmem:[%s6092_s5 + $0xf0] sm:$0xff]  ;;  %v4948_v24 = vld [vmem:[%s6092_s5 + $0xd8] sm:$0xff]  ;;  %v4958_v45 = vld [vmem:[%s6092_s5 + $0x120] sm:$0xff] }
 0x2b6   :  { %v5157_v32 = vpop.eup %5156  ;;  %v1044_v5 = vsel %vm5754_vm0, %v5595_v41, %v1040_v53  ;;  %v1048_v6 = vor.u32 1.1754944e-38, %v1047_v56  ;;  %v4935_v41 = vld [vmem:[%s6092_s5 + $0x78] sm:$0xff]  ;;  %v4956_v51 = vld [vmem:[%s6092_s5 + $0x110] sm:$0xff]  ;;  %v4954_v53 = vld [vmem:[%s6092_s5 + $0x100] sm:$0xff]  ;;  %vm2192_vm11 = vcmask 130048  }
 0x2b7   :  { %v1127_v33 = vmul.f32 %v5157_v32, %v5624_v12  ;;  %v1115_v25 = vadd.f32 %v5155_v63, %v1114_v26  ;;  %vm1132_vm7 = vweird.f32 %v5157_v32  ;;  %v1104_v55 = vsel %vm5716_vm8, %v5622_v58, %v1100_v44  ;;  %v4927_v56 = vld [vmem:[%s6092_s5 + $0x38] sm:$0xff]  ;;  %v4922_v26 = vld [vmem:[%s6092_s5 + $0x10] sm:$0xff] }
 0x2b8   :  { %vm1133_vm12 = vmor %vm1131_vm10, %vm1132_vm7  ;;  %v1045_v58 = vand.u32 2147483647, %v5575_v17  ;;  %v1109_v61 = vsel %vm1106_vm13, %v1108_v46, %v1104_v55  ;;  %v4934_v17 = vld [vmem:[%s6092_s5 + $0x70] sm:$0xff]  ;;  %v4957_v0 = vld [vmem:[%s6092_s5 + $0x118] sm:$0xff] }
 0x2b9   :  { %v1128_v40 = vsub.f32 1.0, %v1127_v33  ;;  %v1119_v43 = vsel %vm1118_vm3, %v5155_v63, %v1115_v25  ;;  %v4936_v63 = vld [vmem:[%s6091_s4 + $0x8] sm:$0xff]  ;;  %vm1076_vm3 = vcmp.eq.f32.partialorder %v1075_v38, 8.507059e+37  ;;  %v4920_v33 = vld [vmem:[%s6092_s5] sm:$0xff]  ;;  %v4964_v44 = vld [vmem:[%s6092_s5 + $0x150] sm:$0xff] }
 0x2ba   :  { %v1124_v37 = vsel %vm1121_vm4, %v1123_v30, %v1119_v43  ;;  %v1079_v1 = vsel %vm1076_vm3, %v1078_v4, %v1074_v60  ;;  %vm1046_vm14 = vcmp.eq.f32.partialorder %v1045_v58, 8.507059e+37  ;;  %v4945_v25 = vld [vmem:[%s6092_s5 + $0xc0] sm:$0xff]  ;;  %v4968_v30 = vld [vmem:[%s6092_s5 + $0x170] sm:$0xff]  ;;  %v4978_v4 = vld [vmem:[%s6092_s5 + $0x1b8] sm:$0xff] }
 0x2bb   :  { %v1129_v48 = vmul.f32 %v5157_v32, %v1128_v40  ;;  %v5708_v50 = vpack.c.bf16 %v1124_v37, %v1094_v28  ;;  %v1049_v7 = vsel %vm1046_vm14, %v1048_v6, %v1044_v5  ;;  %v4965_v40 = vld [vmem:[%s6092_s5 + $0x158] sm:$0xff]  ;;  %v4960_v43 = vld [vmem:[%s6092_s5 + $0x130] sm:$0xff]  ;;  %v4959_v28 = vld [vmem:[%s6092_s5 + $0x128] sm:$0xff] }
 0x2bc   :  { %v5775_v47 = vpack.c.bf16 %v1079_v1, %v1049_v7  ;;  %v4963_v37 = vld [vmem:[%s6092_s5 + $0x148] sm:$0xff]  ;;  %v4983_v7 = vld [vmem:[%s6092_s5 + $0x1e0] sm:$0xff] }
 0x2bd   :  { %1162 = vmatpush.bf16.msra.mxu1 %v5708_v50  ;;  %1235 = vmatpush.bf16.msra.mxu0 %v5708_v50  ;;  %v1130_v27 = vadd.f32 %v5157_v32, %v1129_v48  ;;  %v4962_v48 = vld [vmem:[%s6092_s5 + $0x140] sm:$0xff]  ;;  %v4984_v5 = vld [vmem:[%s6092_s5 + $0x1e8] sm:$0xff] }
 0x2be   :  { %1557 = vmatpush.bf16.msrb.mxu2 %v5708_v50 }
 0x2bf   :  { %v1134_v12 = vsel %vm1133_vm12, %v5157_v32, %v1130_v27  ;;  %v4947_v32 = vld [vmem:[%s6092_s5 + $0xd0] sm:$0xff] }
 0x2c0   :  { %v1139_v62 = vsel %vm1136_vm15, %v1138_v59, %v1134_v12 }
 0x2c1   :  { %1163 = vmatpush.bf16.msra.mxu1 %v5737_v57  ;;  %1236 = vmatpush.bf16.msra.mxu0 %v5737_v57  ;;  %v5760_v36 = vpack.c.bf16 %v1139_v62, %v1109_v61  ;;  %v4953_v61 = vld [vmem:[%s6091_s4 + $0x10] sm:$0xff] }
 0x2c2   :  { %1558 = vmatpush.bf16.msrb.mxu2 %v5737_v57 }
 0x2c3   :  { %1176 = vmatpush.bf16.msrb.mxu3 %v5760_v36 }
 0x2c4   :  { %3903 = vmatmul.msk.bf16.vlgmr.msra.gmra.mxu1 %vm1152_vm1, %v4919_v18  ;;  %3911 = vmatmul.msk.bf16.vlgmr.msra.gmra.mxu0 %vm1152_vm1, %v4936_v63 }
 0x2c5   :  { %1249 = vmatpush.bf16.msrb.mxu1 %v5760_v36  ;;  %1512 = vmatpush.bf16.msrb.mxu0 %v4927_v56 }
 0x2c7   :  { %1177 = vmatpush.bf16.msrb.mxu3 %v5775_v47 }
 0x2c9   :  { %1250 = vmatpush.bf16.msrb.mxu1 %v5775_v47  ;;  %1513 = vmatpush.bf16.msrb.mxu0 %v4926_v11 }
 0x2ca   :  { %3904 = vmatmul.msk.bf16.vlgmr.msrb.gmra.mxu3 %vm1152_vm1, %v4919_v18 }
 0x2cb   :  { %1402 = vmatpush.bf16.msra.mxu3 %v4952_v9 }
 0x2cd   :  { %1526 = vmatpush.bf16.msra.mxu1 %v4935_v41  ;;  %1514 = vmatpush.bf16.msrb.mxu0 %v4925_v19  ;;  %v4976_v41 = vld [vmem:[%s6092_s5 + $0x1a8] sm:$0xff]  ;;  %v4974_v19 = vld [vmem:[%s6092_s5 + $0x198] sm:$0xff] }
 0x2cf   :  { %1403 = vmatpush.bf16.msra.mxu3 %v4951_v13  ;;  %v4981_v13 = vld [vmem:[%s6092_s5 + $0x1d0] sm:$0xff] }
 0x2d1   :  { %1527 = vmatpush.bf16.msra.mxu1 %v4934_v17  ;;  %1515 = vmatpush.bf16.msrb.mxu0 %v4924_v3  ;;  %v4975_v17 = vld [vmem:[%s6092_s5 + $0x1a0] sm:$0xff]  ;;  %v4980_v3 = vld [vmem:[%s6092_s5 + $0x1c8] sm:$0xff] }
 0x2d3   :  { %1404 = vmatpush.bf16.msra.mxu3 %v4950_v15 }
 0x2d4   :  { %3912 = vmatmul.msk.bf16.vlgmr.msrb.gmra.mxu1 %vm1152_vm1, %v4936_v63  ;;  %v4970_v63 = vld [vmem:[%s6091_s4 + $0x18] sm:$0xff] }
 0x2d5   :  { %1528 = vmatpush.bf16.msra.mxu1 %v4933_v10  ;;  %1516 = vmatpush.bf16.msrb.mxu0 %v4923_v21 }
 0x2d7   :  { %1405 = vmatpush.bf16.msra.mxu3 %v4949_v20 }
 0x2d9   :  { %1529 = vmatpush.bf16.msra.mxu1 %v4932_v14  ;;  %1517 = vmatpush.bf16.msrb.mxu0 %v4922_v26  ;;  %v4979_v26 = vld [vmem:[%s6092_s5 + $0x1c0] sm:$0xff] }
 0x2db   :  { %1406 = vmatpush.bf16.msra.mxu3 %v4948_v24 }
 0x2dd   :  { %1530 = vmatpush.bf16.msra.mxu1 %v4931_v16  ;;  %1518 = vmatpush.bf16.msrb.mxu0 %v4921_v49  ;;  %v4973_v16 = vld [vmem:[%s6092_s5 + $0x190] sm:$0xff]  ;;  %v4971_v49 = vld [vmem:[%s6092_s5 + $0x180] sm:$0xff] }
 0x2df   :  { %1407 = vmatpush.bf16.msra.mxu3 %v4947_v32  ;;  %v4995_v32 = vld [vmem:[%s6092_s5 + $0x238] sm:$0xff] }
 0x2e1   :  { %1531 = vmatpush.bf16.msra.mxu1 %v4930_v22  ;;  %1519 = vmatpush.bf16.msrb.mxu0 %v4920_v33 }
 0x2e3   :  { %1408 = vmatpush.bf16.msra.mxu3 %v4946_v31 }
 0x2e5   :  { %1532 = vmatpush.bf16.msra.mxu1 %v4929_v29  ;;  %1724 = vmatpush.bf16.msra.mxu0 %v4969_v2  ;;  %v4972_v29 = vld [vmem:[%s6092_s5 + $0x188] sm:$0xff]  ;;  %v4987_v2 = vld [vmem:[%s6091_s4 + $0x20] sm:$0xff] }
 0x2e7   :  { %1409 = vmatpush.bf16.msra.mxu3 %v4945_v25 }
 0x2e9   :  { %1533 = vmatpush.bf16.msra.mxu1 %v4928_v8  ;;  %1725 = vmatpush.bf16.msra.mxu0 %v4968_v30 }
 0x2eb   :  { %1710 = vmatpush.bf16.msrb.mxu3 %v4961_v34 }
 0x2ed   :  { %1757 = vmatpush.bf16.msrb.mxu1 %v5708_v50  ;;  %1726 = vmatpush.bf16.msra.mxu0 %v4967_v35 }
 0x2ef   :  { %1711 = vmatpush.bf16.msrb.mxu3 %v4960_v43  ;;  %v5003_v43 = vld [vmem:[%s6092_s5 + $0x278] sm:$0xff] }
 0x2f1   :  { %1758 = vmatpush.bf16.msrb.mxu1 %v5737_v57  ;;  %1727 = vmatpush.bf16.msra.mxu0 %v4966_v39 }
 0x2f3   :  { %1712 = vmatpush.bf16.msrb.mxu3 %v4959_v28  ;;  %v4992_v28 = vld [vmem:[%s6092_s5 + $0x220] sm:$0xff] }
 0x2f5   :  { %1728 = vmatpush.bf16.msra.mxu0 %v4965_v40  ;;  %v4994_v40 = vld [vmem:[%s6092_s5 + $0x230] sm:$0xff] }
 0x2f7   :  { %1713 = vmatpush.bf16.msrb.mxu3 %v4958_v45  ;;  %v4991_v45 = vld [vmem:[%s6092_s5 + $0x218] sm:$0xff] }
 0x2f9   :  { %1729 = vmatpush.bf16.msra.mxu0 %v4964_v44  ;;  %v4993_v44 = vld [vmem:[%s6092_s5 + $0x228] sm:$0xff] }
 0x2fb   :  { %1714 = vmatpush.bf16.msrb.mxu3 %v4957_v0  ;;  %v4990_v0 = vld [vmem:[%s6092_s5 + $0x210] sm:$0xff] }
 0x2fd   :  { %1730 = vmatpush.bf16.msra.mxu0 %v4963_v37  ;;  %v5002_v37 = vld [vmem:[%s6092_s5 + $0x270] sm:$0xff] }
 0x2ff   :  { %1715 = vmatpush.bf16.msrb.mxu3 %v4956_v51  ;;  %v5000_v51 = vld [vmem:[%s6092_s5 + $0x260] sm:$0xff] }
 0x301   :  { %1731 = vmatpush.bf16.msra.mxu0 %v4962_v48  ;;  %v5001_v48 = vld [vmem:[%s6092_s5 + $0x268] sm:$0xff] }
 0x303   :  { %1716 = vmatpush.bf16.msrb.mxu3 %v4955_v52  ;;  %v4989_v52 = vld [vmem:[%s6092_s5 + $0x208] sm:$0xff] }
 0x307   :  { %1717 = vmatpush.bf16.msrb.mxu3 %v4954_v53  ;;  %v4999_v53 = vld [vmem:[%s6092_s5 + $0x258] sm:$0xff] }
 0x341   :  { %v1165_v54 = vpop.f32.mrf.mxu1  ;;  %v1238_v55 = vpop.f32.mrf.mxu0 }
 0x349   :  { %v1167_v27 = vpop.f32.mrf.mxu1  ;;  %v1240_v42 = vpop.f32.mrf.mxu0 }
 0x34a   :  { %v1184_v38 = vpack.c.bf16 %v1167_v27, %v1165_v54  ;;  %v1257_v46 = vpack.c.bf16 %v1240_v42, %v1238_v55  ;;  %v4988_v55 = vld [vmem:[%s6092_s5 + $0x200] sm:$0xff]  ;;  %v4998_v27 = vld [vmem:[%s6092_s5 + $0x250] sm:$0xff]  ;;  %v4997_v42 = vld [vmem:[%s6092_s5 + $0x248] sm:$0xff] }
 0x34c   :  { %1396 = vmatmul.bf16.vlgmr.msra.gmra.mxu2 %v1257_v46  ;;  %1520 = vmatmul.bf16.vlgmr.msrb.gmra.mxu0 %v1184_v38 }
 0x34d   :  { %1571 = vmatpush.bf16.msra.mxu2 %v5760_v36  ;;  %1971 = vmatpush.bf16.msrb.mxu0 %v5760_v36  ;;  %v1179_v59 = vpop.f32.mrf.mxu3 }
 0x351   :  { %1572 = vmatpush.bf16.msra.mxu2 %v5775_v47  ;;  %1972 = vmatpush.bf16.msrb.mxu0 %v5775_v47  ;;  %v1252_v58 = vpop.f32.mrf.mxu1 }
 0x355   :  { %v1181_v12 = vpop.f32.mrf.mxu3 }
 0x356   :  { %v1185_v60 = vpack.c.bf16 %v1181_v12, %v1179_v59  ;;  %v4996_v59 = vld [vmem:[%s6092_s5 + $0x240] sm:$0xff] }
 0x358   :  { %1534 = vmatmul.bf16.vlgmr.msra.gmra.mxu1 %v1185_v60 }
 0x359   :  { %v1254_v62 = vpop.f32.mrf.mxu1  ;;  %1910 = vmatpush.bf16.msra.mxu1 %v4978_v4 }
 0x35a   :  { %v1258_v18 = vpack.c.bf16 %v1254_v62, %v1252_v58 }
 0x35c   :  { %1410 = vmatmul.bf16.vlgmr.msra.gmra.mxu3 %v1258_v18  ;;  %4079 = vmatmul.msk.bf16.vlgmr.msrb.gmra.mxu2 %vm1152_vm1, %v4953_v61 }
 0x35d   :  { %1771 = vmatpush.bf16.msrb.mxu2 %v5760_v36  ;;  %1957 = vmatpush.bf16.msra.mxu3 %v5708_v50  ;;  %v4977_v36 = vld [vmem:[%s6092_s5 + $0x1b0] sm:$0xff] }
 0x35e   :  { %1911 = vmatpush.bf16.msra.mxu1 %v4977_v36 }
 0x361   :  { %1772 = vmatpush.bf16.msrb.mxu2 %v5775_v47  ;;  %1958 = vmatpush.bf16.msra.mxu3 %v5737_v57  ;;  %v4985_v57 = vld [vmem:[%s6092_s5 + $0x1f0] sm:$0xff]  ;;  %v4982_v47 = vld [vmem:[%s6092_s5 + $0x1d8] sm:$0xff] }
 0x362   :  { %1912 = vmatpush.bf16.msra.mxu1 %v4976_v41 }
 0x366   :  { %1913 = vmatpush.bf16.msra.mxu1 %v4975_v17 }
 0x368   :  { %4183 = vmatmul.msk.bf16.vlgmr.msrb.gmra.mxu1 %vm1152_vm1, %v4970_v63 }
 0x36a   :  { %1914 = vmatpush.bf16.msra.mxu1 %v4974_v19 }
 0x36c   :  { %4080 = vmatmul.msk.bf16.vlgmr.msra.gmra.mxu2 %vm1152_vm1, %v4953_v61 }
 0x36d   :  { %1924 = vmatpush.bf16.msra.mxu2 %v4986_v23 }
 0x36e   :  { %1915 = vmatpush.bf16.msra.mxu1 %v4973_v16 }
 0x371   :  { %1925 = vmatpush.bf16.msra.mxu2 %v4985_v57 }
 0x372   :  { %1916 = vmatpush.bf16.msra.mxu1 %v4972_v29 }
 0x375   :  { %1926 = vmatpush.bf16.msra.mxu2 %v4984_v5 }
 0x376   :  { %1917 = vmatpush.bf16.msra.mxu1 %v4971_v49 }
 0x379   :  { %1927 = vmatpush.bf16.msra.mxu2 %v4983_v7 }
 0x37c   :  { %4184 = vmatmul.msk.bf16.vlgmr.msrb.gmra.mxu2 %vm1152_vm1, %v4970_v63 }
 0x37d   :  { %1928 = vmatpush.bf16.msra.mxu2 %v4982_v47 }
 0x381   :  { %1929 = vmatpush.bf16.msra.mxu2 %v4981_v13 }
 0x385   :  { %1930 = vmatpush.bf16.msra.mxu2 %v4980_v3 }
 0x389   :  { %1931 = vmatpush.bf16.msra.mxu2 %v4979_v26 }
 0x3c9   :  { %v1521_v9 = vpop.f32.mrf.mxu0 }
 0x3cf   :  { %v1397_v50 = vpop.f32.mrf.mxu2 }
 0x3d1   :  { %v1523_v46 = vpop.f32.mrf.mxu0 }
 0x3d5   :  { %v1535_v6 = vpop.f32.mrf.mxu1 }
 0x3d7   :  { %v5933_v1 = vpop.f32.mrf.mxu2 }
 0x3dd   :  { %v5947_v56 = vpop.f32.mrf.mxu1 }
 0x3df   :  { %v1411_v10 = vpop.f32.mrf.mxu3  ;;  %v1560_v11 = vpop.f32.mrf.mxu2 }
 0x3e0   :  { %v1412_v14 = vadd.f32 %v1411_v10, %v1397_v50 }
 0x3e2   :  { %v1522_v15 = vadd.f32 %v1521_v9, %v1412_v14 }
 0x3e4   :  { %v5961_v20 = vadd.f32 %v1535_v6, %v1522_v15 }
 0x3e5   :  { %v1760_v21 = vpop.f32.mrf.mxu1 }
 0x3e7   :  { %v1562_v22 = vpop.f32.mrf.mxu2  ;;  %v1413_v54 = vpop.f32.mrf.mxu3 }
 0x3e8   :  { %v1579_v24 = vpack.c.bf16 %v1562_v22, %v1560_v11  ;;  %v1414_v60 = vadd.f32 %v1413_v54, %v5933_v1 }
 0x3ea   :  { %1718 = vmatmul.bf16.vlgmr.msrb.gmra.mxu3 %v1579_v24  ;;  %v1524_v18 = vadd.f32 %v1523_v46, %v1414_v60  ;;  %v5022_v60 = vld [vmem:[#allocation7 + $0x10] sm:$0xff] }
 0x3eb   :  { %2110 = vmatpush.bf16.msrb.mxu3 %v4995_v32 }
 0x3ec   :  { %v1538_v50 = vadd.f32 %v5947_v56, %v1524_v18  ;;  %v5123_v56 = vld [vmem:[%s6093_s6] ss:$0 sm:$0xff]  ;;  %v5020_v18 = vld [vmem:[#allocation8 + $0x70] sm:$0xff] }
 0x3ed   :  { %v1762_v8 = vpop.f32.mrf.mxu1 }
 0x3ee   :  { %v1779_v31 = vpack.c.bf16 %v1762_v8, %v1760_v21 }
 0x3ef   :  { %v1574_v33 = vpop.f32.mrf.mxu2  ;;  %2111 = vmatpush.bf16.msrb.mxu3 %v4994_v40 }
 0x3f0   :  { %1918 = vmatmul.bf16.vlgmr.msra.gmra.mxu1 %v1779_v31 }
 0x3f3   :  { %2112 = vmatpush.bf16.msrb.mxu3 %v4993_v44 }
 0x3f7   :  { %v1576_v25 = vpop.f32.mrf.mxu2  ;;  %2113 = vmatpush.bf16.msrb.mxu3 %v4992_v28 }
 0x3f8   :  { %v1580_v34 = vpack.c.bf16 %v1576_v25, %v1574_v33 }
 0x3fa   :  { %1732 = vmatmul.bf16.vlgmr.msra.gmra.mxu0 %v1580_v34  ;;  %4287 = vmatmul.msk.bf16.vlgmr.msra.gmra.mxu3 %vm1152_vm1, %v4987_v2 }
 0x3fb   :  { %2124 = vmatpush.bf16.msra.mxu0 %v5003_v43  ;;  %2114 = vmatpush.bf16.msrb.mxu3 %v4991_v45 }
 0x3ff   :  { %v1774_v30 = vpop.f32.mrf.mxu2  ;;  %2125 = vmatpush.bf16.msra.mxu0 %v5002_v37  ;;  %2115 = vmatpush.bf16.msrb.mxu3 %v4990_v0 }
 0x403   :  { %2126 = vmatpush.bf16.msra.mxu0 %v5001_v48  ;;  %2116 = vmatpush.bf16.msrb.mxu3 %v4989_v52 }
 0x407   :  { %v1776_v35 = vpop.f32.mrf.mxu2  ;;  %2127 = vmatpush.bf16.msra.mxu0 %v5000_v51  ;;  %2117 = vmatpush.bf16.msrb.mxu3 %v4988_v55 }
 0x408   :  { %v1780_v39 = vpack.c.bf16 %v1776_v35, %v1774_v30 }
 0x40a   :  { %1932 = vmatmul.bf16.vlgmr.msra.gmra.mxu2 %v1780_v39  ;;  %4288 = vmatmul.msk.bf16.vlgmr.msrb.gmra.mxu0 %vm1152_vm1, %v4987_v2 }
 0x40b   :  { %2128 = vmatpush.bf16.msra.mxu0 %v4999_v53 }
 0x40f   :  { %2129 = vmatpush.bf16.msra.mxu0 %v4998_v27 }
 0x413   :  { %2130 = vmatpush.bf16.msra.mxu0 %v4997_v42 }
 0x417   :  { %2131 = vmatpush.bf16.msra.mxu0 %v4996_v59  ;;  %v5021_v59 = vld [vmem:[#allocation8 + $0x78] sm:$0xff] }
 0x46d   :  { %v1719_v38 = vpop.f32.mrf.mxu3  ;;  %v1919_v47 = vpop.f32.mrf.mxu1 }
 0x475   :  { %v1721_v58 = vpop.f32.mrf.mxu3  ;;  %v1921_v19 = vpop.f32.mrf.mxu1 }
 0x477   :  { %v1733_v12 = vpop.f32.mrf.mxu0 }
 0x478   :  { %v1734_v61 = vadd.f32 %v1733_v12, %v1719_v38  ;;  %v5012_v38 = vld [vmem:[#allocation8 + $0x38] sm:$0xff]  ;;  %v5013_v12 = vld [vmem:[#allocation7 + $0x8] sm:$0xff] }
 0x47a   :  { %v1738_v62 = vadd.f32 %v1734_v61, %v5961_v20  ;;  %v5030_v61 = vld [vmem:[#allocation8 + $0xb8] sm:$0xff] }
 0x47b   :  { %2485 = vmatpush.bf16.msrb.mxu0 %v5030_v61  ;;  %v5055_v61 = vld [vmem:[#allocation10 + $0x30] sm:$0xff] }
 0x47d   :  { %v1960_v63 = vpop.f32.mrf.mxu3 }
 0x47f   :  { %v1735_v23 = vpop.f32.mrf.mxu0 }
 0x480   :  { %v1736_v57 = vadd.f32 %v1735_v23, %v1721_v58  ;;  %v5004_v58 = vld [vmem:[#allocation7] sm:$0xff]  ;;  %v5010_v23 = vld [vmem:[#allocation8 + $0x28] sm:$0xff] }
 0x482   :  { %v1739_v4 = vadd.f32 %v1736_v57, %v1538_v50  ;;  %v5019_v50 = vld [vmem:[#allocation8 + $0x68] sm:$0xff] }
 0x483   :  { %v5028_v57 = vld [vmem:[#allocation8 + $0xa8] sm:$0xff] }
 0x485   :  { %v1962_v36 = vpop.f32.mrf.mxu3 }
 0x486   :  { %v1979_v5 = vpack.c.bf16 %v1962_v36, %v1960_v63  ;;  %v5029_v63 = vld [vmem:[#allocation8 + $0xb0] sm:$0xff]  ;;  %v5018_v36 = vld [vmem:[#allocation8 + $0x60] sm:$0xff] }
 0x487   :  { %v1974_v6 = vpop.f32.mrf.mxu0  ;;  %2486 = vmatpush.bf16.msrb.mxu0 %v5029_v63 }
 0x488   :  { %2118 = vmatmul.bf16.vlgmr.msrb.gmra.mxu3 %v1979_v5  ;;  %v5008_v5 = vld [vmem:[#allocation8 + $0x18] sm:$0xff] }
 0x48b   :  { %2487 = vmatpush.bf16.msrb.mxu0 %v5028_v57  ;;  %v5054_v57 = vld [vmem:[#allocation10 + $0x28] sm:$0xff] }
 0x48d   :  { %v1933_v17 = vpop.f32.mrf.mxu2 }
 0x48e   :  { %v1934_v1 = vadd.f32 %v1933_v17, %v1919_v47  ;;  %v5016_v47 = vld [vmem:[#allocation8 + $0x50] sm:$0xff]  ;;  %v5006_v17 = vld [vmem:[#allocation8 + $0x8] sm:$0xff] }
 0x48f   :  { %v1976_v7 = vpop.f32.mrf.mxu0 }
 0x490   :  { %v1980_v41 = vpack.c.bf16 %v1976_v7, %v1974_v6  ;;  %v1938_v11 = vadd.f32 %v1934_v1, %v1738_v62  ;;  %v5011_v62 = vld [vmem:[#allocation8 + $0x30] sm:$0xff]  ;;  %v5017_v6 = vld [vmem:[#allocation8 + $0x58] sm:$0xff]  ;;  %v5015_v1 = vld [vmem:[#allocation8 + $0x48] sm:$0xff] }
 0x491   :  { %v5031_v7 = vld [vmem:[#allocation7 + $0x18] sm:$0xff] }
 0x492   :  { %2132 = vmatmul.bf16.vlgmr.msra.gmra.mxu0 %v1980_v41  ;;  %v5007_v41 = vld [vmem:[#allocation8 + $0x10] sm:$0xff] }
 0x495   :  { %v1935_v14 = vpop.f32.mrf.mxu2 }
 0x496   :  { %v1936_v3 = vadd.f32 %v1935_v14, %v1921_v19  ;;  %v5038_v19 = vld [vmem:[#allocation8 + $0xf0] sm:$0xff] }
 0x497   :  { %v5025_v14 = vld [vmem:[#allocation8 + $0x90] sm:$0xff] }
 0x498   :  { %v1939_v24 = vadd.f32 %v1936_v3, %v1739_v4  ;;  %v5009_v4 = vld [vmem:[#allocation8 + $0x20] sm:$0xff]  ;;  %v5024_v3 = vld [vmem:[#allocation8 + $0x88] sm:$0xff] }
 0x50b   :  { %v2119_v9 = vpop.f32.mrf.mxu3 }
 0x50f   :  { %v2133_v10 = vpop.f32.mrf.mxu0 }
 0x510   :  { %v2134_v13 = vadd.f32 %v2133_v10, %v2119_v9  ;;  %v5005_v9 = vld [vmem:[#allocation8] sm:$0xff] }
 0x511   :  { %v5027_v10 = vld [vmem:[#allocation8 + $0xa0] sm:$0xff] }
 0x512   :  { %v2138_v15 = vadd.f32 %v2134_v13, %v1938_v11  ;;  %v5014_v11 = vld [vmem:[#allocation8 + $0x40] sm:$0xff]  ;;  %v5039_v13 = vld [vmem:[#allocation8 + $0xf8] sm:$0xff]  ;;  %2488 = vmatpush.bf16.msrb.mxu0 %v5027_v10 }
 0x513   :  { %v2121_v21 = vpop.f32.mrf.mxu3 }
 0x514   :  { %v2144_v16 = vadd.f32 %v5123_v56, %v2138_v15  ;;  %v5037_v15 = vld [vmem:[#allocation8 + $0xe8] sm:$0xff] }
 0x516   :  { %v4385_v20 = vmul.f32 -1.442695, %v2144_v16  ;;  %v5036_v16 = vld [vmem:[#allocation8 + $0xe0] sm:$0xff] }
 0x517   :  { %v2135_v22 = vpop.f32.mrf.mxu0 }
 0x518   :  { %5158 = vpow2.f32 %v4385_v20  ;;  %v2136_v26 = vadd.f32 %v2135_v22, %v2121_v21  ;;  %v5023_v20 = vld [vmem:[#allocation8 + $0x80] sm:$0xff]  ;;  %v5035_v21 = vld [vmem:[#allocation8 + $0xd8] sm:$0xff]  ;;  %v5034_v22 = vld [vmem:[#allocation8 + $0xd0] sm:$0xff] }
 0x51a   :  { %v2139_v29 = vadd.f32 %v2136_v26, %v1939_v24  ;;  %v5033_v24 = vld [vmem:[#allocation8 + $0xc8] sm:$0xff] }
 0x51c   :  { %v2145_v32 = vadd.f32 %v5123_v56, %v2139_v29  ;;  %v5026_v56 = vld [vmem:[#allocation8 + $0x98] sm:$0xff]  ;;  %v5032_v29 = vld [vmem:[#allocation8 + $0xc0] sm:$0xff] }
 0x51d   :  { %2489 = vmatpush.bf16.msrb.mxu0 %v5026_v56  ;;  %v5068_v56 = vld [vmem:[#allocation10 + $0x98] sm:$0xff] }
 0x51e   :  { %v5159_v49 = vpop.eup %5158  ;;  %v4386_v8 = vmul.f32 -1.442695, %v2145_v32  ;;  %v5048_v32 = vld [vmem:[#allocation8 + $0x138] sm:$0xff] }
 0x51f   :  { %v2152_v31 = vadd.f32 1.0, %v5159_v49 }
 0x520   :  { %5160 = vpow2.f32 %v4386_v8 }
 0x521   :  { %5162 = vrcp.f32 %v2152_v31  ;;  %vm2159_vm4 = vweird.f32 %v2152_v31  ;;  %v2165_v28 = vand.u32 2147483648, %v2152_v31  ;;  %v2163_v45 = vand.u32 2147483647, %v2152_v31  ;;  %2490 = vmatpush.bf16.msrb.mxu0 %v5025_v14  ;;  %v5051_v14 = vld [vmem:[#allocation10 + $0x10] sm:$0xff] }
 0x523   :  { %v2166_v53 = vor.u32 1.1754944e-38, %v2165_v28  ;;  %vm2164_vm9 = vcmp.eq.f32.partialorder %v2163_v45, 8.507059e+37  ;;  %v5046_v28 = vld [vmem:[#allocation8 + $0x128] sm:$0xff]  ;;  %v5044_v45 = vld [vmem:[#allocation8 + $0x118] sm:$0xff] }
 0x525   :  { %2491 = vmatpush.bf16.msrb.mxu0 %v5024_v3 }
 0x526   :  { %v5161_v33 = vpop.eup %5160 }
 0x527   :  { %v5163_v2 = vpop.eup %5162  ;;  %v2153_v25 = vadd.f32 1.0, %v5161_v33 }
 0x528   :  { %v2155_v34 = vmul.f32 %v5163_v2, %v2152_v31  ;;  %vm2160_vm2 = vweird.f32 %v5163_v2 }
 0x529   :  { %5164 = vrcp.f32 %v2153_v25  ;;  %v2180_v37 = vand.u32 2147483648, %v2153_v25  ;;  %v2178_v0 = vand.u32 2147483647, %v2153_v25  ;;  %vm2161_vm6 = vmor %vm2159_vm4, %vm2160_vm2  ;;  %vm2174_vm7 = vweird.f32 %v2153_v25  ;;  %2492 = vmatpush.bf16.msrb.mxu0 %v5023_v20 }
 0x52a   :  { %v2156_v30 = vsub.f32 1.0, %v2155_v34 }
 0x52b   :  { %v2181_v54 = vor.u32 1.1754944e-38, %v2180_v37  ;;  %vm2179_vm10 = vcmp.eq.f32.partialorder %v2178_v0, 8.507059e+37  ;;  %v5045_v37 = vld [vmem:[#allocation8 + $0x120] sm:$0xff]  ;;  %v5042_v0 = vld [vmem:[#allocation8 + $0x108] sm:$0xff] }
 0x52c   :  { %v2157_v35 = vmul.f32 %v5163_v2, %v2156_v30 }
 0x52e   :  { %v2158_v44 = vadd.f32 %v5163_v2, %v2157_v35 }
 0x52f   :  { %v5165_v39 = vpop.eup %5164 }
 0x530   :  { %v2170_v40 = vmul.f32 %v5165_v39, %v2153_v25  ;;  %vm2175_vm5 = vweird.f32 %v5165_v39  ;;  %v2162_v51 = vsel %vm2161_vm6, %v5163_v2, %v2158_v44  ;;  %v5047_v44 = vld [vmem:[#allocation8 + $0x130] sm:$0xff] }
 0x531   :  { %vm2176_vm8 = vmor %vm2174_vm7, %vm2175_vm5  ;;  %v2167_v27 = vsel %vm2164_vm9, %v2166_v53, %v2162_v51  ;;  %v5041_v51 = vld [vmem:[#allocation8 + $0x100] sm:$0xff] }
 0x532   :  { %v2171_v43 = vsub.f32 1.0, %v2170_v40 }
 0x534   :  { %v2172_v48 = vmul.f32 %v5165_v39, %v2171_v43 }
 0x536   :  { %v2173_v52 = vadd.f32 %v5165_v39, %v2172_v48  ;;  %v5043_v48 = vld [vmem:[#allocation8 + $0x110] sm:$0xff] }
 0x538   :  { %v2177_v55 = vsel %vm2176_vm8, %v5165_v39, %v2173_v52  ;;  %v5040_v39 = vld [vmem:[#allocation7 + $0x20] sm:$0xff] }
 0x539   :  { %v2182_v42 = vsel %vm2179_vm10, %v2181_v54, %v2177_v55 }
 0x53a   :  { %v2184_v46 = vpack.c.bf16 %v2182_v42, %v2167_v27 }
 0x53c   :  { %2203 = vmatpush.bf16.msrb.mxu1 %v2184_v46  ;;  %2245 = vmatpush.bf16.msrb.mxu2 %v2184_v46 }
 0x53d   :  { %2412 = vmatpush.bf16.msra.mxu3 %v2184_v46 }
 0x53f   :  { %4391 = vmatmul.msk.bf16.vlgmr.msrb.gmra.mxu1 %vm2192_vm11, %v5004_v58  ;;  %4396 = vmatmul.msk.bf16.vlgmr.msrb.gmra.mxu2 %vm2192_vm11, %v5013_v12  ;;  %v5072_v58 = vld [vmem:[#allocation10 + $0xb8] sm:$0xff] }
 0x540   :  { %2380 = vmatpush.bf16.msra.mxu2 %v5012_v38  ;;  %2318 = vmatpush.bf16.msra.mxu1 %v5021_v59  ;;  %v5056_v59 = vld [vmem:[#allocation10 + $0x38] sm:$0xff] }
 0x541   :  { %2519 = vmatpush.bf16.msrb.mxu3 %v2184_v46 }
 0x542   :  { %4465 = vmatmul.msk.bf16.vlgmr.msra.gmra.mxu3 %vm2192_vm11, %v5022_v60 }
 0x544   :  { %2381 = vmatpush.bf16.msra.mxu2 %v5011_v62  ;;  %2319 = vmatpush.bf16.msra.mxu1 %v5020_v18  ;;  %v5071_v62 = vld [vmem:[#allocation10 + $0xb0] sm:$0xff] }
 0x545   :  { %2699 = vmatpush.bf16.msra.mxu3 %v5048_v32 }
 0x548   :  { %2382 = vmatpush.bf16.msra.mxu2 %v5010_v23  ;;  %2320 = vmatpush.bf16.msra.mxu1 %v5019_v50  ;;  %v5124_v23 = vld [vmem:[%s6096_s9] ss:$0 sm:$0xff] }
 0x549   :  { %2700 = vmatpush.bf16.msra.mxu3 %v5047_v44 }
 0x54c   :  { %2383 = vmatpush.bf16.msra.mxu2 %v5009_v4  ;;  %2321 = vmatpush.bf16.msra.mxu1 %v5018_v36  ;;  %v5070_v4 = vld [vmem:[#allocation10 + $0xa8] sm:$0xff] }
 0x54d   :  { %2701 = vmatpush.bf16.msra.mxu3 %v5046_v28 }
 0x550   :  { %2384 = vmatpush.bf16.msra.mxu2 %v5008_v5  ;;  %2322 = vmatpush.bf16.msra.mxu1 %v5017_v6 }
 0x551   :  { %2702 = vmatpush.bf16.msra.mxu3 %v5045_v37 }
 0x552   :  { %4502 = vmatmul.msk.bf16.vlgmr.msrb.gmra.mxu3 %vm2192_vm11, %v5031_v7 }
 0x554   :  { %2385 = vmatpush.bf16.msra.mxu2 %v5007_v41  ;;  %2323 = vmatpush.bf16.msra.mxu1 %v5016_v47  ;;  %v5053_v47 = vld [vmem:[#allocation10 + $0x20] sm:$0xff] }
 0x555   :  { %2703 = vmatpush.bf16.msra.mxu3 %v5044_v45 }
 0x558   :  { %2386 = vmatpush.bf16.msra.mxu2 %v5006_v17  ;;  %2324 = vmatpush.bf16.msra.mxu1 %v5015_v1  ;;  %v5069_v17 = vld [vmem:[#allocation10 + $0xa0] sm:$0xff] }
 0x559   :  { %2704 = vmatpush.bf16.msra.mxu3 %v5043_v48 }
 0x55c   :  { %2387 = vmatpush.bf16.msra.mxu2 %v5005_v9  ;;  %2325 = vmatpush.bf16.msra.mxu1 %v5014_v11 }
 0x55d   :  { %2705 = vmatpush.bf16.msra.mxu3 %v5042_v0 }
 0x560   :  { %2626 = vmatpush.bf16.msrb.mxu2 %v2184_v46  ;;  %2592 = vmatpush.bf16.msrb.mxu1 %v5039_v13  ;;  %v5052_v13 = vld [vmem:[#allocation10 + $0x18] sm:$0xff] }
 0x561   :  { %2706 = vmatpush.bf16.msra.mxu3 %v5041_v51 }
 0x564   :  { %2593 = vmatpush.bf16.msrb.mxu1 %v5038_v19 }
 0x565   :  { %3036 = vmatpush.bf16.msrb.mxu3 %v5072_v58  ;;  %v5087_v58 = vld [vmem:[#allocation10 + $0x130] sm:$0xff] }
 0x568   :  { %2594 = vmatpush.bf16.msrb.mxu1 %v5037_v15  ;;  %v5067_v15 = vld [vmem:[#allocation10 + $0x90] sm:$0xff] }
 0x569   :  { %3037 = vmatpush.bf16.msrb.mxu3 %v5071_v62  ;;  %v5085_v62 = vld [vmem:[#allocation10 + $0x120] sm:$0xff] }
 0x56c   :  { %2595 = vmatpush.bf16.msrb.mxu1 %v5036_v16 }
 0x56d   :  { %3038 = vmatpush.bf16.msrb.mxu3 %v5070_v4  ;;  %v5081_v4 = vld [vmem:[#allocation10 + $0x100] sm:$0xff] }
 0x570   :  { %2596 = vmatpush.bf16.msrb.mxu1 %v5035_v21 }
 0x571   :  { %3039 = vmatpush.bf16.msrb.mxu3 %v5069_v17  ;;  %v5077_v17 = vld [vmem:[#allocation10 + $0xe0] sm:$0xff] }
 0x574   :  { %2597 = vmatpush.bf16.msrb.mxu1 %v5034_v22  ;;  %v5050_v22 = vld [vmem:[#allocation10 + $0x8] sm:$0xff] }
 0x575   :  { %3040 = vmatpush.bf16.msrb.mxu3 %v5068_v56 }
 0x578   :  { %2598 = vmatpush.bf16.msrb.mxu1 %v5033_v24  ;;  %v5066_v24 = vld [vmem:[#allocation10 + $0x88] sm:$0xff] }
 0x579   :  { %3041 = vmatpush.bf16.msrb.mxu3 %v5067_v15 }
 0x57c   :  { %2599 = vmatpush.bf16.msrb.mxu1 %v5032_v29  ;;  %v5065_v29 = vld [vmem:[#allocation10 + $0x80] sm:$0xff] }
 0x57d   :  { %3042 = vmatpush.bf16.msrb.mxu3 %v5066_v24 }
 0x581   :  { %3043 = vmatpush.bf16.msrb.mxu3 %v5065_v29 }
 0x5bc   :  { %v2205_v26 = vpop.f32.mrf.mxu1 }
 0x5c2   :  { %v2247_v49 = vpop.f32.mrf.mxu2 }
 0x5c4   :  { %v2207_v31 = vpop.f32.mrf.mxu1 }
 0x5c5   :  { %v2414_v8 = vpop.f32.mrf.mxu3  ;;  %v2210_v33 = vpack.c.bf16 %v2207_v31, %v2205_v26  ;;  %v5049_v26 = vld [vmem:[#allocation10] sm:$0xff] }
 0x5c7   :  { %2388 = vmatmul.bf16.vlgmr.msra.gmra.mxu2 %v2210_v33 }
 0x5ca   :  { %v2249_v2 = vpop.f32.mrf.mxu2 }
 0x5cb   :  { %v2252_v25 = vpack.c.bf16 %v2249_v2, %v2247_v49 }
 0x5cd   :  { %v2416_v34 = vpop.f32.mrf.mxu3  ;;  %2326 = vmatmul.bf16.vlgmr.msra.gmra.mxu1 %v2252_v25 }
 0x5ce   :  { %v2419_v30 = vpack.c.bf16 %v2416_v34, %v2414_v8  ;;  %2939 = vmatpush.bf16.msra.mxu1 %v5056_v59  ;;  %v5063_v59 = vld [vmem:[#allocation10 + $0x70] sm:$0xff] }
 0x5d0   :  { %2493 = vmatmul.bf16.vlgmr.msrb.gmra.mxu0 %v2419_v30 }
 0x5d2   :  { %2940 = vmatpush.bf16.msra.mxu1 %v5055_v61  ;;  %v5061_v61 = vld [vmem:[#allocation10 + $0x60] sm:$0xff] }
 0x5d5   :  { %v2521_v35 = vpop.f32.mrf.mxu3 }
 0x5d6   :  { %2941 = vmatpush.bf16.msra.mxu1 %v5054_v57  ;;  %v5082_v57 = vld [vmem:[#allocation10 + $0x108] sm:$0xff] }
 0x5d7   :  { %4539 = vmatmul.msk.bf16.vlgmr.msrb.gmra.mxu2 %vm2192_vm11, %v5040_v39 }
 0x5da   :  { %2942 = vmatpush.bf16.msra.mxu1 %v5053_v47  ;;  %v5078_v47 = vld [vmem:[#allocation10 + $0xe8] sm:$0xff] }
 0x5dd   :  { %v2523_v40 = vpop.f32.mrf.mxu3 }
 0x5de   :  { %v2526_v43 = vpack.c.bf16 %v2523_v40, %v2521_v35  ;;  %2943 = vmatpush.bf16.msra.mxu1 %v5052_v13  ;;  %v5074_v13 = vld [vmem:[#allocation10 + $0xc8] sm:$0xff] }
 0x5e0   :  { %2600 = vmatmul.bf16.vlgmr.msrb.gmra.mxu1 %v2526_v43 }
 0x5e2   :  { %2944 = vmatpush.bf16.msra.mxu1 %v5051_v14  ;;  %v5073_v14 = vld [vmem:[#allocation10 + $0xc0] sm:$0xff] }
 0x5e6   :  { %2945 = vmatpush.bf16.msra.mxu1 %v5050_v22 }
 0x5ea   :  { %2946 = vmatpush.bf16.msra.mxu1 %v5049_v26  ;;  %v4743_v26 = vld [vmem:[%s6097_s10 + $0x5] sm:$0x1] }
 0x64a   :  { %v2389_v52 = vpop.f32.mrf.mxu2  ;;  %v2327_v42 = vpop.f32.mrf.mxu1 }
 0x64b   :  { %v2390_v12 = vadd.f32 %v2389_v52, %v2327_v42  ;;  %v4641_v42 = vld [vmem:[%s6097_s10 + $0x2] sm:$0x1] }
 0x64d   :  { %v2494_v46 = vpop.f32.mrf.mxu0 }
 0x64e   :  { %v2499_v18 = vadd.f32 %v2494_v46, %v2390_v12  ;;  %v5064_v46 = vld [vmem:[#allocation10 + $0x78] sm:$0xff]  ;;  %v5062_v12 = vld [vmem:[#allocation10 + $0x68] sm:$0xff] }
 0x652   :  { %v2391_v53 = vpop.f32.mrf.mxu2  ;;  %v2329_v38 = vpop.f32.mrf.mxu1 }
 0x653   :  { %v2392_v36 = vadd.f32 %v2391_v53, %v2329_v38  ;;  %v5088_v38 = vld [vmem:[#allocation10 + $0x138] sm:$0xff] }
 0x655   :  { %v2496_v6 = vpop.f32.mrf.mxu0 }
 0x656   :  { %v2500_v1 = vadd.f32 %v2496_v6, %v2392_v36  ;;  %v5059_v36 = vld [vmem:[#allocation10 + $0x50] sm:$0xff]  ;;  %v5057_v6 = vld [vmem:[#allocation10 + $0x40] sm:$0xff] }
 0x65a   :  { %v2628_v54 = vpop.f32.mrf.mxu2 }
 0x65d   :  { %v2601_v60 = vpop.f32.mrf.mxu1 }
 0x65e   :  { %v2606_v63 = vadd.f32 %v2601_v60, %v2499_v18  ;;  %v5086_v60 = vld [vmem:[#allocation10 + $0x128] sm:$0xff]  ;;  %v5060_v18 = vld [vmem:[#allocation10 + $0x58] sm:$0xff] }
 0x662   :  { %v2630_v55 = vpop.f32.mrf.mxu2 }
 0x663   :  { %v2633_v27 = vpack.c.bf16 %v2630_v55, %v2628_v54  ;;  %v2760_v55 = vld [vmem:[%s6097_s10] sm:$0x1] }
 0x665   :  { %2707 = vmatmul.bf16.vlgmr.msra.gmra.mxu3 %v2633_v27  ;;  %v2603_v41 = vpop.f32.mrf.mxu1  ;;  %v4575_v27 = vld [vmem:[%s6097_s10 + $0x1] sm:$0x1] }
 0x666   :  { %v2607_v10 = vadd.f32 %v2603_v41, %v2500_v1  ;;  %v5079_v41 = vld [vmem:[#allocation10 + $0xf0] sm:$0xff]  ;;  %v5076_v1 = vld [vmem:[#allocation10 + $0xd8] sm:$0xff] }
 0x6e8   :  { %v2708_v50 = vpop.f32.mrf.mxu3 }
 0x6e9   :  { %v2713_v5 = vadd.f32 %v2708_v50, %v2606_v63  ;;  %v4675_v63 = vld [vmem:[%s6097_s10 + $0x3] sm:$0x1]  ;;  %v5083_v50 = vld [vmem:[#allocation10 + $0x110] sm:$0xff] }
 0x6eb   :  { %v2719_v7 = vadd.f32 %v5124_v23, %v2713_v5  ;;  %v5058_v5 = vld [vmem:[#allocation10 + $0x48] sm:$0xff] }
 0x6ed   :  { %v4572_v9 = vmul.f32 -1.442695, %v2719_v7  ;;  %v5080_v7 = vld [vmem:[#allocation10 + $0xf8] sm:$0xff] }
 0x6ef   :  { %5166 = vpow2.f32 %v4572_v9  ;;  %v5075_v9 = vld [vmem:[#allocation10 + $0xd0] sm:$0xff] }
 0x6f0   :  { %v2710_v11 = vpop.f32.mrf.mxu3 }
 0x6f1   :  { %v2714_v19 = vadd.f32 %v2710_v11, %v2607_v10 }
 0x6f3   :  { %v2720_v3 = vadd.f32 %v5124_v23, %v2714_v19  ;;  %v5084_v23 = vld [vmem:[#allocation10 + $0x118] sm:$0xff] }
 0x6f5   :  { %v5167_v16 = vpop.eup %5166  ;;  %v4573_v20 = vmul.f32 -1.442695, %v2720_v3 }
 0x6f6   :  { %v2727_v21 = vadd.f32 1.0, %v5167_v16  ;;  %v4709_v16 = vld [vmem:[%s6097_s10 + $0x4] sm:$0x1] }
 0x6f7   :  { %5168 = vpow2.f32 %v4573_v20 }
 0x6f8   :  { %5170 = vrcp.f32 %v2727_v21  ;;  %vm2734_vm13 = vweird.f32 %v2727_v21  ;;  %v2740_v39 = vand.u32 2147483648, %v2727_v21  ;;  %v2738_v43 = vand.u32 2147483647, %v2727_v21 }
 0x6fa   :  { %v2741_v48 = vor.u32 1.1754944e-38, %v2740_v39  ;;  %vm2739_vm14 = vcmp.eq.f32.partialorder %v2738_v43, 8.507059e+37  ;;  %v5103_v39 = vld [vmem:[#allocation10 + $0x1b0] sm:$0xff] }
 0x6fd   :  { %v5169_v32 = vpop.eup %5168 }
 0x6fe   :  { %v5171_v49 = vpop.eup %5170  ;;  %v2728_v8 = vadd.f32 1.0, %v5169_v32 }
 0x6ff   :  { %v2730_v31 = vmul.f32 %v5171_v49, %v2727_v21  ;;  %vm2735_vm12 = vweird.f32 %v5171_v49 }
 0x700   :  { %5172 = vrcp.f32 %v2728_v8  ;;  %v2755_v40 = vand.u32 2147483648, %v2728_v8  ;;  %v2753_v28 = vand.u32 2147483647, %v2728_v8  ;;  %vm2736_vm0 = vmor %vm2734_vm13, %vm2735_vm12  ;;  %vm2749_vm1 = vweird.f32 %v2728_v8 }
 0x701   :  { %v2731_v33 = vsub.f32 1.0, %v2730_v31  ;;  %v5095_v31 = vld [vmem:[#allocation10 + $0x170] sm:$0xff] }
 0x702   :  { %v2756_v0 = vor.u32 1.1754944e-38, %v2755_v40  ;;  %vm2754_vm2 = vcmp.eq.f32.partialorder %v2753_v28, 8.507059e+37  ;;  %v5102_v28 = vld [vmem:[#allocation10 + $0x1a8] sm:$0xff] }
 0x703   :  { %v2732_v2 = vmul.f32 %v5171_v49, %v2731_v33  ;;  %v5094_v33 = vld [vmem:[#allocation10 + $0x168] sm:$0xff] }
 0x705   :  { %v2733_v30 = vadd.f32 %v5171_v49, %v2732_v2  ;;  %v5093_v2 = vld [vmem:[#allocation10 + $0x160] sm:$0xff] }
 0x706   :  { %v5173_v25 = vpop.eup %5172 }
 0x707   :  { %v2745_v34 = vmul.f32 %v5173_v25, %v2728_v8  ;;  %vm2750_vm15 = vweird.f32 %v5173_v25  ;;  %v2737_v37 = vsel %vm2736_vm0, %v5171_v49, %v2733_v30  ;;  %v4777_v49 = vld [vmem:[%s6097_s10 + $0x6] sm:$0x1]  ;;  %v5096_v8 = vld [vmem:[#allocation10 + $0x178] sm:$0xff] }
 0x708   :  { %vm2751_vm3 = vmor %vm2749_vm1, %vm2750_vm15  ;;  %v2742_v52 = vsel %vm2739_vm14, %v2741_v48, %v2737_v37  ;;  %v5101_v48 = vld [vmem:[#allocation10 + $0x1a0] sm:$0xff] }
 0x709   :  { %v2746_v35 = vsub.f32 1.0, %v2745_v34  ;;  %v5092_v34 = vld [vmem:[#allocation10 + $0x158] sm:$0xff] }
 0x70b   :  { %v2747_v44 = vmul.f32 %v5173_v25, %v2746_v35  ;;  %v5091_v35 = vld [vmem:[#allocation10 + $0x150] sm:$0xff] }
 0x70d   :  { %v2748_v45 = vadd.f32 %v5173_v25, %v2747_v44  ;;  %v5090_v44 = vld [vmem:[#allocation10 + $0x148] sm:$0xff] }
 0x70f   :  { %v2752_v51 = vsel %vm2751_vm3, %v5173_v25, %v2748_v45  ;;  %v5104_v25 = vld [vmem:[#allocation10 + $0x1b8] sm:$0xff]  ;;  %v5089_v45 = vld [vmem:[#allocation10 + $0x140] sm:$0xff] }
 0x710   :  { %v2757_v53 = vsel %vm2754_vm2, %v2756_v0, %v2752_v51  ;;  %v5100_v51 = vld [vmem:[#allocation10 + $0x198] sm:$0xff] }
 0x711   :  { %v6039_v54 = vpack.c.bf16 %v2757_v53, %v2742_v52 }
 0x713   :  { %2771 = vmatpush.bf16.msra.mxu0 %v6039_v54  ;;  %2806 = vmatpush.bf16.msra.mxu2 %v6039_v54 }
 0x714   :  { %3160 = vmatpush.bf16.msrb.mxu1 %v6039_v54  ;;  %3258 = vmatpush.bf16.msra.mxu3 %v6039_v54 }
 0x716   :  { %4574 = vmatmul.msk.bf16.vlgmr.msra.gmra.mxu0 %vm2192_vm11, %v2760_v55  ;;  %4576 = vmatmul.msk.bf16.vlgmr.msra.gmra.mxu2 %vm2192_vm11, %v4575_v27  ;;  %v5098_v55 = vld [vmem:[#allocation10 + $0x188] sm:$0xff] }
 0x717   :  { %2964 = vmatpush.bf16.msrb.mxu2 %v6039_v54  ;;  %2878 = vmatpush.bf16.msrb.mxu0 %v5064_v46  ;;  %v5097_v46 = vld [vmem:[#allocation10 + $0x180] sm:$0xff] }
 0x71b   :  { %3062 = vmatpush.bf16.msra.mxu2 %v6039_v54  ;;  %2879 = vmatpush.bf16.msrb.mxu0 %v5063_v59  ;;  %v5112_v59 = vld [vmem:[#allocation10 + $0x1f8] sm:$0xff] }
 0x71f   :  { %2880 = vmatpush.bf16.msrb.mxu0 %v5062_v12  ;;  %v5111_v12 = vld [vmem:[#allocation10 + $0x1f0] sm:$0xff] }
 0x723   :  { %2881 = vmatpush.bf16.msrb.mxu0 %v5061_v61  ;;  %v5110_v61 = vld [vmem:[#allocation10 + $0x1e8] sm:$0xff] }
 0x726   :  { %4642 = vmatmul.msk.bf16.vlgmr.msrb.gmra.mxu2 %vm2192_vm11, %v4641_v42 }
 0x727   :  { %3232 = vmatpush.bf16.msrb.mxu2 %v5088_v38  ;;  %2882 = vmatpush.bf16.msrb.mxu0 %v5060_v18 }
 0x72b   :  { %3233 = vmatpush.bf16.msrb.mxu2 %v5087_v58  ;;  %2883 = vmatpush.bf16.msrb.mxu0 %v5059_v36  ;;  %v4811_v58 = vld [vmem:[%s6097_s10 + $0x7] sm:$0x1] }
 0x72f   :  { %3234 = vmatpush.bf16.msrb.mxu2 %v5086_v60  ;;  %2884 = vmatpush.bf16.msrb.mxu0 %v5058_v5 }
 0x733   :  { %3235 = vmatpush.bf16.msrb.mxu2 %v5085_v62  ;;  %2885 = vmatpush.bf16.msrb.mxu0 %v5057_v6  ;;  %v5109_v6 = vld [vmem:[#allocation10 + $0x1e0] sm:$0xff] }
 0x736   :  { %4676 = vmatmul.msk.bf16.vlgmr.msra.gmra.mxu2 %vm2192_vm11, %v4675_v63 }
 0x737   :  { %3236 = vmatpush.bf16.msrb.mxu2 %v5084_v23  ;;  %3134 = vmatpush.bf16.msra.mxu0 %v5080_v7  ;;  %v5108_v7 = vld [vmem:[#allocation10 + $0x1d8] sm:$0xff] }
 0x73b   :  { %3237 = vmatpush.bf16.msrb.mxu2 %v5083_v50  ;;  %3135 = vmatpush.bf16.msra.mxu0 %v5079_v41  ;;  %v5107_v41 = vld [vmem:[#allocation10 + $0x1d0] sm:$0xff] }
 0x73f   :  { %3238 = vmatpush.bf16.msrb.mxu2 %v5082_v57  ;;  %3136 = vmatpush.bf16.msra.mxu0 %v5078_v47  ;;  %v5106_v47 = vld [vmem:[#allocation10 + $0x1c8] sm:$0xff] }
 0x743   :  { %3239 = vmatpush.bf16.msrb.mxu2 %v5081_v4  ;;  %3137 = vmatpush.bf16.msra.mxu0 %v5077_v17  ;;  %v5105_v17 = vld [vmem:[#allocation10 + $0x1c0] sm:$0xff] }
 0x747   :  { %3454 = vmatpush.bf16.msra.mxu2 %v6039_v54  ;;  %3138 = vmatpush.bf16.msra.mxu0 %v5076_v1 }
 0x74b   :  { %3139 = vmatpush.bf16.msra.mxu0 %v5075_v9 }
 0x74f   :  { %3140 = vmatpush.bf16.msra.mxu0 %v5074_v13 }
 0x753   :  { %3141 = vmatpush.bf16.msra.mxu0 %v5073_v14 }
 0x793   :  { %v2773_v10 = vpop.f32.mrf.mxu0 }
 0x794   :  { %v2777_v11 = vpack.c.bf16 %v2773_v10, %v2773_v10 }
 0x796   :  { %2947 = vmatmul.bf16.vlgmr.msra.gmra.mxu1 %v2777_v11 }
 0x797   :  { %3330 = vmatpush.bf16.msra.mxu1 %v5096_v8 }
 0x799   :  { %v2808_v56 = vpop.f32.mrf.mxu2 }
 0x79a   :  { %v2812_v19 = vpack.c.bf16 %v2808_v56, %v2808_v56 }
 0x79b   :  { %v2775_v15 = vpop.f32.mrf.mxu0  ;;  %3331 = vmatpush.bf16.msra.mxu1 %v5095_v31 }
 0x79c   :  { %2886 = vmatmul.bf16.vlgmr.msrb.gmra.mxu0 %v2812_v19 }
 0x79d   :  { %3428 = vmatpush.bf16.msrb.mxu0 %v5104_v25 }
 0x79f   :  { %3332 = vmatpush.bf16.msra.mxu1 %v5094_v33 }
 0x7a1   :  { %v2810_v3 = vpop.f32.mrf.mxu2  ;;  %3429 = vmatpush.bf16.msrb.mxu0 %v5103_v39 }
 0x7a3   :  { %3333 = vmatpush.bf16.msra.mxu1 %v5093_v2 }
 0x7a5   :  { %3430 = vmatpush.bf16.msrb.mxu0 %v5102_v28 }
 0x7a6   :  { %4710 = vmatmul.msk.bf16.vlgmr.msrb.gmra.mxu1 %vm2192_vm11, %v4709_v16 }
 0x7a7   :  { %3334 = vmatpush.bf16.msra.mxu1 %v5092_v34 }
 0x7a9   :  { %v2966_v20 = vpop.f32.mrf.mxu2  ;;  %3431 = vmatpush.bf16.msrb.mxu0 %v5101_v48 }
 0x7aa   :  { %v2970_v21 = vpack.c.bf16 %v2966_v20, %v2966_v20 }
 0x7ab   :  { %3335 = vmatpush.bf16.msra.mxu1 %v5091_v35 }
 0x7ac   :  { %3044 = vmatmul.bf16.vlgmr.msrb.gmra.mxu3 %v2970_v21  ;;  %v5125_v21 = vld [vmem:[%s6099_s12] ss:$0 sm:$0xff] }
 0x7ad   :  { %3356 = vmatpush.bf16.msrb.mxu3 %v6039_v54  ;;  %3432 = vmatpush.bf16.msrb.mxu0 %v5100_v51  ;;  %v5099_v54 = vld [vmem:[#allocation10 + $0x190] sm:$0xff] }
 0x7af   :  { %3336 = vmatpush.bf16.msra.mxu1 %v5090_v44 }
 0x7b1   :  { %v2968_v22 = vpop.f32.mrf.mxu2  ;;  %3433 = vmatpush.bf16.msrb.mxu0 %v5099_v54 }
 0x7b3   :  { %3337 = vmatpush.bf16.msra.mxu1 %v5089_v45 }
 0x7b5   :  { %3434 = vmatpush.bf16.msrb.mxu0 %v5098_v55 }
 0x7b9   :  { %v3064_v24 = vpop.f32.mrf.mxu2  ;;  %3435 = vmatpush.bf16.msrb.mxu0 %v5097_v46 }
 0x7ba   :  { %v3068_v29 = vpack.c.bf16 %v3064_v24, %v3064_v24 }
 0x7bc   :  { %3142 = vmatmul.bf16.vlgmr.msra.gmra.mxu0 %v3068_v29  ;;  %4744 = vmatmul.msk.bf16.vlgmr.msra.gmra.mxu3 %vm2192_vm11, %v4743_v26 }
 0x7bd   :  { %3526 = vmatpush.bf16.msra.mxu3 %v5112_v59 }
 0x7c1   :  { %v3066_v32 = vpop.f32.mrf.mxu2  ;;  %3527 = vmatpush.bf16.msra.mxu3 %v5111_v12 }
 0x7c5   :  { %3528 = vmatpush.bf16.msra.mxu3 %v5110_v61 }
 0x7c9   :  { %3529 = vmatpush.bf16.msra.mxu3 %v5109_v6 }
 0x7cc   :  { %4778 = vmatmul.msk.bf16.vlgmr.msrb.gmra.mxu3 %vm2192_vm11, %v4777_v49 }
 0x7cd   :  { %3530 = vmatpush.bf16.msra.mxu3 %v5108_v7 }
 0x7d1   :  { %3531 = vmatpush.bf16.msra.mxu3 %v5107_v41 }
 0x7d5   :  { %3532 = vmatpush.bf16.msra.mxu3 %v5106_v47 }
 0x7d9   :  { %3533 = vmatpush.bf16.msra.mxu3 %v5105_v17 }
 0x813   :  { %v2948_v30 = vpop.f32.mrf.mxu1 }
 0x819   :  { %v2887_v40 = vpop.f32.mrf.mxu0 }
 0x81a   :  { %v2949_v43 = vadd.f32 %v2948_v30, %v2887_v40 }
 0x81b   :  { %v2950_v37 = vpop.f32.mrf.mxu1 }
 0x821   :  { %v2889_v0 = vpop.f32.mrf.mxu0 }
 0x823   :  { %v3162_v52 = vpop.f32.mrf.mxu1 }
 0x824   :  { %v3166_v53 = vpack.c.bf16 %v3162_v52, %v3162_v52 }
 0x826   :  { %3240 = vmatmul.bf16.vlgmr.msrb.gmra.mxu2 %v3166_v53 }
 0x82b   :  { %v3164_v27 = vpop.f32.mrf.mxu1 }
 0x82f   :  { %v3045_v42 = vpop.f32.mrf.mxu3 }
 0x830   :  { %v3049_v38 = vadd.f32 %v3045_v42, %v2949_v43 }
 0x836   :  { %4812 = vmatmul.msk.bf16.vlgmr.msra.gmra.mxu2 %vm2192_vm11, %v4811_v58 }
 0x837   :  { %v3047_v60 = vpop.f32.mrf.mxu3 }
 0x839   :  { %v3143_v62 = vpop.f32.mrf.mxu0 }
 0x83a   :  { %v3147_v18 = vadd.f32 %v3143_v62, %v3049_v38 }
 0x83f   :  { %v3260_v63 = vpop.f32.mrf.mxu3 }
 0x840   :  { %v3264_v23 = vpack.c.bf16 %v3260_v63, %v3260_v63 }
 0x841   :  { %v3145_v50 = vpop.f32.mrf.mxu0 }
 0x842   :  { %3338 = vmatmul.bf16.vlgmr.msra.gmra.mxu1 %v3264_v23 }
 0x847   :  { %v3262_v57 = vpop.f32.mrf.mxu3 }
 0x84f   :  { %v3358_v4 = vpop.f32.mrf.mxu3 }
 0x850   :  { %v3362_v36 = vpack.c.bf16 %v3358_v4, %v3358_v4 }
 0x852   :  { %3436 = vmatmul.bf16.vlgmr.msrb.gmra.mxu0 %v3362_v36 }
 0x857   :  { %v3360_v5 = vpop.f32.mrf.mxu3 }
 0x8a9   :  { %v3241_v1 = vpop.f32.mrf.mxu2 }
 0x8aa   :  { %v3245_v9 = vadd.f32 %v3241_v1, %v3147_v18 }
 0x8b1   :  { %v3243_v10 = vpop.f32.mrf.mxu2 }
 0x8b9   :  { %v3456_v11 = vpop.f32.mrf.mxu2 }
 0x8ba   :  { %v3460_v13 = vpack.c.bf16 %v3456_v11, %v3456_v11 }
 0x8bc   :  { %3534 = vmatmul.bf16.vlgmr.msra.gmra.mxu3 %v3460_v13 }
 0x8bf   :  { %v3339_v56 = vpop.f32.mrf.mxu1 }
 0x8c0   :  { %v3343_v19 = vadd.f32 %v3339_v56, %v3245_v9 }
 0x8c1   :  { %v3458_v14 = vpop.f32.mrf.mxu2 }
 0x8c7   :  { %v3341_v15 = vpop.f32.mrf.mxu1 }
 0x8cf   :  { %v3437_v3 = vpop.f32.mrf.mxu0 }
 0x8d0   :  { %v3441_v16 = vadd.f32 %v3437_v3, %v3343_v19 }
 0x8d7   :  { %v3439_v20 = vpop.f32.mrf.mxu0 }
 0x93f   :  { %v3535_v22 = vpop.f32.mrf.mxu3 }
 0x940   :  { %v3539_v24 = vadd.f32 %v3535_v22, %v3441_v16 }
 0x942   :  { %v3544_v26 = vadd.f32 %v5125_v21, %v3539_v24 }
 0x944   :  { %3545 = vst [vmem:[#allocation11] sm:$0x3] %v3544_v26 }
 0x945   :  { %3556 = dma.vmem_to_hbm [thread:$0]  %s3552_s20, 32, %s3554_s0, [#allocation4]  }
 0x947   :  { %v3537_v29 = vpop.f32.mrf.mxu3 }
 0x948   :  { %5324 = dma.done.wait [#allocation4], 32  }
 0x949   :  { %5325 = vsyncadd [#allocation4], 4294967264 }
 0x94a   :  { %3561 = vsyncpa [#allocation3], 1 }
 0x94b   :  { %3562 = vsyncpa [#allocation6], 1 }
 0x94c   :  { %3563 = vsyncpa [#allocation9], 1 }
 0x94d   :  { %3564 = vsyncpa [#allocation4], 1 }

</bundles_post_ra>
